<compile_context>
chip_gen: v5e
topology: v5e:2x2
jax: 0.10.0
libtpu: 0.0.40
codegen_flags: <defaults>
</compile_context>

<pallas_src>
import jax
import jax.numpy as jnp
from jax.experimental import pallas as pl
from jax.experimental.pallas import tpu as pltpu

LANE = 128   # vreg lane width (fast / last axis)
SUB = 8      # f32 sublane tile (second-to-last axis)


# ---------------------------------------------------------------------------
# Pallas kernel: fused GCN layer 1 -> GCN layer 2 -> MLP classifier
# (one batch-tile of tile_graphs graphs per grid step)
# ---------------------------------------------------------------------------
def circuit_gnn_kernel(a_ref, x_ref, w2_ref, wc1_ref, small_ref, o_ref):
    """a_ref   : (1, TB, N, N) bf16  per-graph normalized adjacency
       x_ref   : (M, F)        f32   stacked node features, native width (M=TB*N)
       w2_ref  : (128, 128)    bf16  zero-padded GCN-2 weight (resident)
       wc1_ref : (128, 128)    bf16  zero-padded classifier-1 weight (resident)
       small_ref:(8, 128)      f32   rows 0..F-1 = W1 rows; row F = b1; F+1 = b2;
                                     F+2 = bc1 (lane 127 carries 1.0);
                                     F+3 = Wc2[:,0] (lane 127 carries bc2)
       o_ref   : (M, 1)        f32   per-node delay prediction
    """
    bf16 = jnp.bfloat16
    M, F = x_ref.shape
    _, TB, N, _ = a_ref.shape

    a = a_ref[0]             # (TB, N, N) bf16
    x = x_ref[...]           # (M, F)     f32
    small = small_ref[...]   # (8, 128)   f32
    b1 = small[F:F + 1, :]
    b2 = small[F + 1:F + 2, :]
    bc1 = small[F + 2:F + 3, :]       # lane 127 == 1.0 -> makes c1[:,127] == 1
    wc2_row = small[F + 3:F + 4, :]   # lane 127 == bc2 -> folds the final bias

    # ---- GCNConv 1:  relu(A_hat @ (X W1) + b1) -------------------------------
    # X @ W1 has only F (=4) real contraction terms: F broadcast-FMA outer
    # products on the VPU instead of a nearly empty MXU pass.
    xw1 = x[:, 0:1] * small[0:1, :]
    for k in range(1, F):
        xw1 = xw1 + x[:, k:k + 1] * small[k:k + 1, :]
    # Apply A_hat graph-by-graph (batched MXU matmul, no block-diagonal matrix).
    axw1 = jnp.einsum("gnm,gmh->gnh", a,
                      xw1.astype(bf16).reshape(TB, N, LANE),
                      preferred_element_type=jnp.float32).reshape(M, LANE)
    h1 = jnp.maximum(axw1 + b1, 0.0)
    # F.dropout(x, training=self.training) is identity in eval mode.
    # TODO(synk): training-mode stochastic dropout not implemented.

    # ---- GCNConv 2:  relu(A_hat @ (h1 W2) + b2) ------------------------------
    hw2 = jnp.dot(h1.astype(bf16), w2_ref[...],
                  preferred_element_type=jnp.float32)
    ah2 = jnp.einsum("gnm,gmh->gnh", a,
                     hw2.astype(bf16).reshape(TB, N, LANE),
                     preferred_element_type=jnp.float32).reshape(M, LANE)
    h2 = jnp.maximum(ah2 + b2, 0.0)

    # ---- classifier: Linear -> ReLU -> (Dropout=id) -> Linear ----------------
    c1 = jnp.dot(h2.astype(bf16), wc1_ref[...],
                 preferred_element_type=jnp.float32) + bc1
    c1 = jnp.maximum(c1, 0.0)                 # lane 127: relu(0 + 1.0) == 1.0
    # Last Linear has a single real output column: elementwise multiply + lane
    # reduction (VPU/XLU) instead of an MXU pass; lane 127 contributes 1.0*bc2.
    out = jnp.sum(c1 * wc2_row, axis=-1, keepdims=True)   # (M, 1)
    o_ref[...] = out


# ---------------------------------------------------------------------------
# Wrapper: pack operands, launch the batched kernel
# ---------------------------------------------------------------------------
def _pad2(m, rows, cols, dtype):
    out = jnp.zeros((rows, cols), dtype)
    return out.at[: m.shape[0], : m.shape[1]].set(m.astype(dtype))


def circuit_gnn_forward(a_hat, x, params, *, tile_graphs=16):
    """Batched fused CircuitGNN forward (batch=None path, eval mode).

    a_hat : (B, N, N) f32 per-graph normalized adjacency
    x     : (B, N, F) f32 per-graph node features
    returns (B, N, 1) f32 per-node prediction
    """
    w1, b1, w2, b2, wc1, bc1, wc2, bc2 = params
    B, N, F = x.shape
    H = w1.shape[1]
    C = wc1.shape[1]
    O = wc2.shape[1]
    assert O == 1, "classifier output is a single delay value"
    assert max(F, H, C) <= LANE and C < LANE   # lane 127 reserved for bc2 fold
    assert F + 4 <= SUB                        # W1 rows + 4 small vectors fit

    # Zero-pad the batch with empty graphs so it tiles evenly; pick tile_graphs
    # so G stays a multiple of 2 when possible (both v7x TensorCores get work).
    G = -(-B // tile_graphs)                   # cdiv
    Bp = G * tile_graphs
    M = tile_graphs * N                        # rows per grid step
    assert M % SUB == 0

    bf16 = jnp.bfloat16

    # Per-graph adjacency, tiled (G, TB, N, N): no block-diagonal in HBM.
    a_p = jnp.zeros((Bp, N, N), jnp.float32).at[:B].set(a_hat)
    a_p = a_p.reshape(G, tile_graphs, N, N).astype(bf16)

    # Node features at native width (no 128-lane padding in HBM).
    x_p = jnp.zeros((Bp, N, F), jnp.float32).at[:B].set(x).reshape(Bp * N, F)

    # Resident 128x128 bf16 MXU weight tiles.
    w2_p = _pad2(w2, LANE, LANE, bf16)
    wc1_p = _pad2(wc1, LANE, LANE, bf16)

    # W1 + all small vectors packed into one (8,128) f32 buffer (one DMA).
    small = jnp.zeros((SUB, LANE), jnp.float32)
    small = small.at[:F, :H].set(w1.astype(jnp.float32))
    small = small.at[F, :H].set(b1.astype(jnp.float32))
    small = small.at[F + 1, :H].set(b2.astype(jnp.float32))
    small = small.at[F + 2, :C].set(bc1.astype(jnp.float32))
    small = small.at[F + 2, LANE - 1].set(1.0)                        # c1[:,127]=1
    small = small.at[F + 3, :C].set(wc2[:, 0].astype(jnp.float32))
    small = small.at[F + 3, LANE - 1].set(bc2[0].astype(jnp.float32))  # folds bc2

    full = lambda g: (0, 0)     # resident weights: same block every step

    out = pl.pallas_call(
        circuit_gnn_kernel,
        out_shape=jax.ShapeDtypeStruct((Bp * N, 1), jnp.float32),
        grid=(G,),
        in_specs=[
            pl.BlockSpec((1, tile_graphs, N, N), lambda g: (g, 0, 0, 0)),  # A_hat
            pl.BlockSpec((M, F), lambda g: (g, 0)),                        # X
            pl.BlockSpec((LANE, LANE), full),                              # W2
            pl.BlockSpec((LANE, LANE), full),                              # Wc1
            pl.BlockSpec((SUB, LANE), full),                               # packed
        ],
        out_specs=pl.BlockSpec((M, 1), lambda g: (g, 0)),
        compiler_params=pltpu.CompilerParams(
            dimension_semantics=("parallel",),   # v7x: batch tiles across 2 TCs
        ),
    )(a_p, x_p, w2_p, wc1_p, small)

    return out.reshape(Bp, N, 1)[:B]


# ---------------------------------------------------------------------------
# JAX glue: normalized adjacency from edge_index (PyG gcn_norm semantics)
# ---------------------------------------------------------------------------
def build_normalized_adjacency(edge_index, num_nodes):
    src = edge_index[0]
    dst = edge_index[1]
    # PyG gcn_norm uses add_remaining_self_loops: drop pre-existing self loops,
    # then add exactly one self loop per node.
    keep = (src != dst).astype(jnp.float32)
    deg = jnp.zeros((num_nodes,), jnp.float32).at[dst].add(keep) + 1.0
    dinv = jax.lax.rsqrt(deg)
    norm = dinv[src] * dinv[dst] * keep
    a = jnp.zeros((num_nodes, num_nodes), jnp.float32).at[dst, src].add(norm)
    a = a + jnp.diag(dinv * dinv)
    return a


# ---------------------------------------------------------------------------
# Deterministic parameter init (shapes from CircuitGNN.__init__)
# ---------------------------------------------------------------------------
def init_params(key, input_dim, hidden_dim, output_dim):
    ks = jax.random.split(key, 6)

    def glorot(k, shape):
        lim = jnp.sqrt(6.0 / (shape[0] + shape[1]))
        return jax.random.uniform(k, shape, jnp.float32, -lim, lim)

    w1 = glorot(ks[0], (input_dim, hidden_dim))
    b1 = jnp.zeros((hidden_dim,), jnp.float32)          # PyG GCNConv bias: zeros
    w2 = glorot(ks[1], (hidden_dim, hidden_dim))
    b2 = jnp.zeros((hidden_dim,), jnp.float32)
    wc1 = glorot(ks[2], (hidden_dim, hidden_dim // 2))
    bc1 = 0.01 * jax.random.normal(ks[3], (hidden_dim // 2,), jnp.float32)
    wc2 = glorot(ks[4], (hidden_dim // 2, output_dim))
    bc2 = 0.01 * jax.random.normal(ks[5], (output_dim,), jnp.float32)
    return (w1, b1, w2, b2, wc1, bc1, wc2, bc2)


# ---------------------------------------------------------------------------
# Pure-JAX references
# ---------------------------------------------------------------------------
def _mm_bf16(p, q):
    return jnp.dot(p.astype(jnp.bfloat16), q.astype(jnp.bfloat16),
                   preferred_element_type=jnp.float32)


def reference_forward_mirror(a, x, params):
    """Per-graph reference with the same bf16-MXU / f32-VPU mix as the kernel."""
    w1, b1, w2, b2, wc1, bc1, wc2, bc2 = params
    hi = jax.lax.Precision.HIGHEST
    xw1 = jnp.dot(x, w1, preferred_element_type=jnp.float32, precision=hi)
    h1 = jnp.maximum(_mm_bf16(a, xw1) + b1, 0.0)
    h2 = jnp.maximum(_mm_bf16(a, _mm_bf16(h1, w2)) + b2, 0.0)
    c1 = jnp.maximum(_mm_bf16(h2, wc1) + bc1, 0.0)
    return jnp.dot(c1, wc2, preferred_element_type=jnp.float32, precision=hi) + bc2


def reference_forward_f32(a, x, params):
    w1, b1, w2, b2, wc1, bc1, wc2, bc2 = params
    hi = jax.lax.Precision.HIGHEST
    mm = lambda p, q: jnp.dot(p, q, preferred_element_type=jnp.float32, precision=hi)
    h1 = jnp.maximum(mm(a, mm(x, w1)) + b1, 0.0)
    h2 = jnp.maximum(mm(a, mm(h1, w2)) + b2, 0.0)
    c1 = jnp.maximum(mm(h2, wc1) + bc1, 0.0)
    return mm(c1, wc2) + bc2


if __name__ == "__main__":
    key = jax.random.PRNGKey(0)
    k_x, k_e, k_p = jax.random.split(key, 3)

    num_graphs = 32      # circuit graphs packed per forward pass
    num_nodes = 16       # gates per circuit
    input_dim = 4        # per-gate features
    hidden_dim = 32
    output_dim = 1
    num_edges = 24       # wires per circuit
    tile_graphs = 16     # 256 rows per grid step; G=2 (keeps both v7x TCs busy)

    x = jax.random.normal(k_x, (num_graphs, num_nodes, input_dim), jnp.float32)
    edge_index = jax.random.randint(
        k_e, (num_graphs, 2, num_edges), 0, num_nodes, jnp.int32)
    params = init_params(k_p, input_dim, hidden_dim, output_dim)

    a_hat = jax.vmap(
        lambda e: build_normalized_adjacency(e, num_nodes))(edge_index)  # (B,N,N)

    out = circuit_gnn_forward(a_hat, x, params, tile_graphs=tile_graphs)
    out = jax.block_until_ready(out)
    assert out.shape == (num_graphs, num_nodes, output_dim)

    # Tight check: reference mirroring the kernel's bf16-input / f32-acc matmuls.
    ref_bf16 = jax.vmap(
        lambda a, xx: reference_forward_mirror(a, xx, params))(a_hat, x)
    assert jnp.allclose(out, ref_bf16, atol=2e-3, rtol=2e-3), \
        float(jnp.max(jnp.abs(out - ref_bf16)))

    # Loose sanity check against pure-f32 math (bounds bf16 quantization error).
    ref_f32 = jax.vmap(
        lambda a, xx: reference_forward_f32(a, xx, params))(a_hat, x)
    assert jnp.allclose(out, ref_f32, atol=1e-1, rtol=1e-1), \
        float(jnp.max(jnp.abs(out - ref_f32)))

    print("KERNEL_OK")
</pallas_src>

<mosaic_0001>
module attributes {stable_mosaic.version = 11 : i64} {
  func.func @circuit_gnn_kernel(%arg0: i32, %arg1: memref<1x16x16x16xbf16, #tpu.memory_space<vmem>>, %arg2: memref<256x4xf32, #tpu.memory_space<vmem>>, %arg3: memref<128x128xbf16, #tpu.memory_space<vmem>>, %arg4: memref<128x128xbf16, #tpu.memory_space<vmem>>, %arg5: memref<8x128xf32, #tpu.memory_space<vmem>>, %arg6: memref<256x1xf32, #tpu.memory_space<vmem>>) attributes {dimension_semantics = [#tpu.dimension_semantics<parallel>], iteration_bounds = array<i64: 2>, scalar_prefetch = 0 : i64, scratch_operands = 0 : i64, tpu.core_type = #tpu.core_type<tc>, window_params = [{transform_indices = @transform_0, window_bounds = array<i64: 1, 16, 16, 16>}, {transform_indices = @transform_1, window_bounds = array<i64: 256, 4>}, {pipeline_mode = #tpu.pipeline_mode<synchronous>, transform_indices = @transform_2, window_bounds = array<i64: 128, 128>}, {pipeline_mode = #tpu.pipeline_mode<synchronous>, transform_indices = @transform_3, window_bounds = array<i64: 128, 128>}, {pipeline_mode = #tpu.pipeline_mode<synchronous>, transform_indices = @transform_4, window_bounds = array<i64: 8, 128>}, {transform_indices = @transform_5, window_bounds = array<i64: 256, 1>}]} {
    %c0 = arith.constant 0 : index
    %c0_0 = arith.constant 0 : index
    %c0_1 = arith.constant 0 : index
    %c0_2 = arith.constant 0 : index
    %0 = vector.load %arg1[%c0, %c0_0, %c0_1, %c0_2] : memref<1x16x16x16xbf16, #tpu.memory_space<vmem>>, vector<1x16x16x16xbf16>
    %1 = vector.shape_cast %0 : vector<1x16x16x16xbf16> to vector<16x16x16xbf16>
    %c0_3 = arith.constant 0 : index
    %c0_4 = arith.constant 0 : index
    %2 = vector.load %arg2[%c0_3, %c0_4] : memref<256x4xf32, #tpu.memory_space<vmem>>, vector<256x4xf32>
    %c0_5 = arith.constant 0 : index
    %c0_6 = arith.constant 0 : index
    %3 = vector.load %arg5[%c0_5, %c0_6] : memref<8x128xf32, #tpu.memory_space<vmem>>, vector<8x128xf32>
    %4 = vector.extract_strided_slice %3 {offsets = [4, 0], sizes = [1, 128], strides = [1, 1]} : vector<8x128xf32> to vector<1x128xf32>
    %5 = vector.extract_strided_slice %3 {offsets = [5, 0], sizes = [1, 128], strides = [1, 1]} : vector<8x128xf32> to vector<1x128xf32>
    %6 = vector.extract_strided_slice %3 {offsets = [6, 0], sizes = [1, 128], strides = [1, 1]} : vector<8x128xf32> to vector<1x128xf32>
    %7 = vector.extract_strided_slice %3 {offsets = [7, 0], sizes = [1, 128], strides = [1, 1]} : vector<8x128xf32> to vector<1x128xf32>
    %8 = vector.extract_strided_slice %2 {offsets = [0, 0], sizes = [256, 1], strides = [1, 1]} : vector<256x4xf32> to vector<256x1xf32>
    %9 = vector.extract_strided_slice %3 {offsets = [0, 0], sizes = [1, 128], strides = [1, 1]} : vector<8x128xf32> to vector<1x128xf32>
    %10 = vector.broadcast %8 : vector<256x1xf32> to vector<256x128xf32>
    %11 = vector.broadcast %9 : vector<1x128xf32> to vector<256x128xf32>
    %12 = arith.mulf %10, %11 : vector<256x128xf32>
    %13 = vector.extract_strided_slice %2 {offsets = [0, 1], sizes = [256, 1], strides = [1, 1]} : vector<256x4xf32> to vector<256x1xf32>
    %14 = vector.extract_strided_slice %3 {offsets = [1, 0], sizes = [1, 128], strides = [1, 1]} : vector<8x128xf32> to vector<1x128xf32>
    %15 = vector.broadcast %13 : vector<256x1xf32> to vector<256x128xf32>
    %16 = vector.broadcast %14 : vector<1x128xf32> to vector<256x128xf32>
    %17 = arith.mulf %15, %16 : vector<256x128xf32>
    %18 = arith.addf %12, %17 : vector<256x128xf32>
    %19 = vector.extract_strided_slice %2 {offsets = [0, 2], sizes = [256, 1], strides = [1, 1]} : vector<256x4xf32> to vector<256x1xf32>
    %20 = vector.extract_strided_slice %3 {offsets = [2, 0], sizes = [1, 128], strides = [1, 1]} : vector<8x128xf32> to vector<1x128xf32>
    %21 = vector.broadcast %19 : vector<256x1xf32> to vector<256x128xf32>
    %22 = vector.broadcast %20 : vector<1x128xf32> to vector<256x128xf32>
    %23 = arith.mulf %21, %22 : vector<256x128xf32>
    %24 = arith.addf %18, %23 : vector<256x128xf32>
    %25 = vector.extract_strided_slice %2 {offsets = [0, 3], sizes = [256, 1], strides = [1, 1]} : vector<256x4xf32> to vector<256x1xf32>
    %26 = vector.extract_strided_slice %3 {offsets = [3, 0], sizes = [1, 128], strides = [1, 1]} : vector<8x128xf32> to vector<1x128xf32>
    %27 = vector.broadcast %25 : vector<256x1xf32> to vector<256x128xf32>
    %28 = vector.broadcast %26 : vector<1x128xf32> to vector<256x128xf32>
    %29 = arith.mulf %27, %28 : vector<256x128xf32>
    %30 = arith.addf %24, %29 : vector<256x128xf32>
    %31 = arith.truncf %30 : vector<256x128xf32> to vector<256x128xbf16>
    %32 = vector.shape_cast %31 : vector<256x128xbf16> to vector<16x16x128xbf16>
    "tpu.trace_start"() <{level = 10 : i32, message = "gnm,gmh->gnh"}> : () -> ()
    %cst = arith.constant dense<0.000000e+00> : vector<16x16x128xf32>
    %33 = tpu.matmul %1, %32, %cst {dimension_numbers = #tpu.dot_dimension_numbers<[2], [1], [1], [2], [0, 0, 0, 1, 1, 2], [0], [0]>} : vector<16x16x16xbf16>, vector<16x16x128xbf16>, vector<16x16x128xf32> -> vector<16x16x128xf32>
    "tpu.trace_stop"() : () -> ()
    %34 = vector.shape_cast %33 : vector<16x16x128xf32> to vector<256x128xf32>
    %35 = vector.broadcast %4 : vector<1x128xf32> to vector<256x128xf32>
    %36 = arith.addf %34, %35 : vector<256x128xf32>
    %cst_7 = arith.constant 0.000000e+00 : f32
    %37 = vector.broadcast %cst_7 : f32 to vector<256x128xf32>
    %38 = arith.maximumf %36, %37 : vector<256x128xf32>
    %39 = arith.truncf %38 : vector<256x128xf32> to vector<256x128xbf16>
    %c0_8 = arith.constant 0 : index
    %c0_9 = arith.constant 0 : index
    %40 = vector.load %arg3[%c0_8, %c0_9] : memref<128x128xbf16, #tpu.memory_space<vmem>>, vector<128x128xbf16>
    %cst_10 = arith.constant dense<0.000000e+00> : vector<256x128xf32>
    %41 = tpu.matmul %39, %40, %cst_10 {dimension_numbers = #tpu.dot_dimension_numbers<[1], [0], [0], [1], [0, 0, 1, 1], [], []>} : vector<256x128xbf16>, vector<128x128xbf16>, vector<256x128xf32> -> vector<256x128xf32>
    %42 = arith.truncf %41 : vector<256x128xf32> to vector<256x128xbf16>
    %43 = vector.shape_cast %42 : vector<256x128xbf16> to vector<16x16x128xbf16>
    "tpu.trace_start"() <{level = 10 : i32, message = "gnm,gmh->gnh"}> : () -> ()
    %cst_11 = arith.constant dense<0.000000e+00> : vector<16x16x128xf32>
    %44 = tpu.matmul %1, %43, %cst_11 {dimension_numbers = #tpu.dot_dimension_numbers<[2], [1], [1], [2], [0, 0, 0, 1, 1, 2], [0], [0]>} : vector<16x16x16xbf16>, vector<16x16x128xbf16>, vector<16x16x128xf32> -> vector<16x16x128xf32>
    "tpu.trace_stop"() : () -> ()
    %45 = vector.shape_cast %44 : vector<16x16x128xf32> to vector<256x128xf32>
    %46 = vector.broadcast %5 : vector<1x128xf32> to vector<256x128xf32>
    %47 = arith.addf %45, %46 : vector<256x128xf32>
    %cst_12 = arith.constant 0.000000e+00 : f32
    %48 = vector.broadcast %cst_12 : f32 to vector<256x128xf32>
    %49 = arith.maximumf %47, %48 : vector<256x128xf32>
    %50 = arith.truncf %49 : vector<256x128xf32> to vector<256x128xbf16>
    %c0_13 = arith.constant 0 : index
    %c0_14 = arith.constant 0 : index
    %51 = vector.load %arg4[%c0_13, %c0_14] : memref<128x128xbf16, #tpu.memory_space<vmem>>, vector<128x128xbf16>
    %cst_15 = arith.constant dense<0.000000e+00> : vector<256x128xf32>
    %52 = tpu.matmul %50, %51, %cst_15 {dimension_numbers = #tpu.dot_dimension_numbers<[1], [0], [0], [1], [0, 0, 1, 1], [], []>} : vector<256x128xbf16>, vector<128x128xbf16>, vector<256x128xf32> -> vector<256x128xf32>
    %53 = vector.broadcast %6 : vector<1x128xf32> to vector<256x128xf32>
    %54 = arith.addf %52, %53 : vector<256x128xf32>
    %cst_16 = arith.constant 0.000000e+00 : f32
    %55 = vector.broadcast %cst_16 : f32 to vector<256x128xf32>
    %56 = arith.maximumf %54, %55 : vector<256x128xf32>
    %57 = vector.broadcast %7 : vector<1x128xf32> to vector<256x128xf32>
    %58 = arith.mulf %56, %57 : vector<256x128xf32>
    %cst_17 = arith.constant dense<0.000000e+00> : vector<256xf32>
    %59 = vector.multi_reduction <add>, %58, %cst_17 [1] : vector<256x128xf32> to vector<256xf32>
    %60 = vector.shape_cast %59 : vector<256xf32> to vector<256x1xf32>
    %c0_18 = arith.constant 0 : index
    %c0_19 = arith.constant 0 : index
    %61 = vector.load %arg6[%c0_18, %c0_19] : memref<256x1xf32, #tpu.memory_space<vmem>>, vector<256x1xf32>
    tpu.vector_store %arg6[%c0_18, %c0_19], %60 {strides = array<i32>} : memref<256x1xf32, #tpu.memory_space<vmem>>, vector<256x1xf32>,
    return
  }
  func.func @transform_0(%arg0: i32) -> (i32, i32, i32, i32) {
    %c0_i32 = arith.constant 0 : i32
    %c0_i32_0 = arith.constant 0 : i32
    %c0_i32_1 = arith.constant 0 : i32
    %c0_i32_2 = arith.constant 0 : i32
    return %arg0, %c0_i32, %c0_i32_0, %c0_i32_1 : i32, i32, i32, i32
  }
  func.func @transform_1(%arg0: i32) -> (i32, i32) {
    %c0_i32 = arith.constant 0 : i32
    %c0_i32_0 = arith.constant 0 : i32
    return %arg0, %c0_i32 : i32, i32
  }
  func.func @transform_2(%arg0: i32) -> (i32, i32) {
    %c0_i32 = arith.constant 0 : i32
    %c0_i32_0 = arith.constant 0 : i32
    %c0_i32_1 = arith.constant 0 : i32
    return %c0_i32, %c0_i32_0 : i32, i32
  }
  func.func @transform_3(%arg0: i32) -> (i32, i32) {
    %c0_i32 = arith.constant 0 : i32
    %c0_i32_0 = arith.constant 0 : i32
    %c0_i32_1 = arith.constant 0 : i32
    return %c0_i32, %c0_i32_0 : i32, i32
  }
  func.func @transform_4(%arg0: i32) -> (i32, i32) {
    %c0_i32 = arith.constant 0 : i32
    %c0_i32_0 = arith.constant 0 : i32
    %c0_i32_1 = arith.constant 0 : i32
    return %c0_i32, %c0_i32_0 : i32, i32
  }
  func.func @transform_5(%arg0: i32) -> (i32, i32) {
    %c0_i32 = arith.constant 0 : i32
    %c0_i32_0 = arith.constant 0 : i32
    return %arg0, %c0_i32 : i32, i32
  }
}

</mosaic_0001>

<bundles_post_ra>
// kernel: tpu_custom_call.1
= control target key start
LH: loop header
LB: loop body
LE: loop exit
PB: predicated region body
PF: predicated region fallthrough
CT: control target
= control target key end

     0   :  { %s3011_s18 = smov 0   ;;  %s3902_s0 = inlined_call_operand.vmem [shape: bf16[2,16,16,16], index: 0, kind: input, shape index: {}]   ;;  %s3903_s1 = inlined_call_operand.vmem [shape: f32[512,4], index: 1, kind: input, shape index: {}]   ;;  %s3904_s2 = inlined_call_operand.vmem [shape: bf16[128,128], index: 2, kind: input, shape index: {}]   ;;  %s3905_s3 = inlined_call_operand.vmem [shape: bf16[128,128], index: 3, kind: input, shape index: {}]   ;;  %s3906_s4 = inlined_call_operand.vmem [shape: f32[8,128], index: 4, kind: input, shape index: {}]   ;;  %s3907_s5 = inlined_call_operand.vmem [shape: f32[512,1], index: 5, kind: output, shape index: {}]  }
   0x1 LB: > { %s3017_s19 = sadd.s32 4294967295, %s2975_s18   ;;  %p2622_p0 = scmp.ge.s32.totalorder %s2975_s18, 1  ;;  %s2975_s18 = sphi %s3011_s18, %s15_s18  }
   0x2   : > { %p198_p1 = scmp.lt.s32.totalorder %s2975_s18, 3 }
   0x4   : > { %p199_p2 = pnand %p2622_p0, %p198_p1 }
   0x5   : > { %s2625_s20 = sshll.u32 (!%p199_p2), %s3017_s19, 5  ;;  %p231_p4 = scmp.lt.s32.totalorder (!%p199_p2), %s3017_s19, 1 }
   0x6   : > { %202 = sbr.rel (%p199_p2) target bundleno = 1301 (0x515), region = 40  ;;  %p237_p3 = scmp.lt.s32.totalorder (!%p199_p2), %s2625_s20, 63 }
   0xb   : > { %v2977_v0 = vmov 1   ;;  %v2978_v1 = vmov 2   ;;  %s3909_s20 = smov (!%p237_p3, %s2625_s20), 63  ;;  %v2979_v6 = vmov 3   ;;  %v2980_v8 = vmov 0   ;;  %v3112_v31 = vld [vmem:[%s3906_s4] sm:$0xff] }
   0xc   : > { %2858 = vset.pattern.permute.xlu0 %v2977_v0  ;;  %2852 = vset.pattern.permute.xlu1 %v2977_v0  ;;  %s2626_s21 = sshll.u32 %s3909_s20, 3  ;;  %v3117_v34 = vperm.slane %v3112_v31, 0  ;;  %v3121_v35 = vperm.slane %v3112_v31, 1  ;;  %v3131_v39 = vperm.slane %v3112_v31, 2  ;;  %v3137_v44 = vperm.slane %v3112_v31, 3  ;;  %s3911_s19 = smov (!%p231_p4, %s3017_s19), 1 }
   0xd   : > { %2853 = vset.pattern.permute.xlu2 %v2978_v1  ;;  %s3033_s24 = scalar_lea.vmem %s3903_s1, %s2626_s21  ;;  %s2791_s27 = sshll.u32 %s3911_s19, 7  ;;  %vm1129_vm0 = vcmask 130048   ;;  %vm2517_vm1 = vcmask 7168  }
   0xe   : > { %v284_v2 = vld [vmem:[%s3033_s24 + $0x18] sm:$0xff]  ;;  %v281_v3 = vld [vmem:[%s3033_s24] sm:$0xff]  ;;  %v282_v4 = vld [vmem:[%s3033_s24 + $0x8] sm:$0xff]  ;;  %s3252_s30 = scalar_lea.vmem %s3902_s0, %s2791_s27  ;;  %s3818_s23 = scalar_lea.vmem %s3907_s5, %s2626_s21 }
   0xf   : > { %520 = vperm.xlu0 %2858, %v284_v2   ;;  %508 = vperm.xlu1 %2852, %v281_v3   ;;  %v286_v5 = vld [vmem:[%s3033_s24 + $0x28] sm:$0xff]  ;;  %v283_v7 = vld [vmem:[%s3033_s24 + $0x10] sm:$0xff]  ;;  %v288_v9 = vld [vmem:[%s3033_s24 + $0x38] sm:$0xff] }
  0x10   : > { %701 = vperm.xlu2 %2853, %v281_v3   ;;  %v3048_v10 = vld [vmem:[%s3033_s24 + $0x50] sm:$0xff]  ;;  %v285_v11 = vld [vmem:[%s3033_s24 + $0x20] sm:$0xff]  ;;  %v3062_v12 = vld [vmem:[%s3033_s24 + $0x58] sm:$0xff] }
  0x11   : > { %v3067_v13 = vld [vmem:[%s3033_s24 + $0x80] sm:$0xff]  ;;  %v287_v14 = vld [vmem:[%s3033_s24 + $0x30] sm:$0xff]  ;;  %v3077_v15 = vld [vmem:[%s3033_s24 + $0x68] sm:$0xff] }
  0x12   : > { %v3085_v17 = vld [vmem:[%s3033_s24 + $0xc0] sm:$0xff]  ;;  %v290_v20 = vld [vmem:[%s3033_s24 + $0x48] sm:$0xff] }
  0x13   : > { %v289_v19 = vld [vmem:[%s3033_s24 + $0x40] sm:$0xff]  ;;  %v3152_v57 = vld [vmem:[%s3033_s24 + $0x88] sm:$0xff] }
  0x14   : > { %v293_v61 = vld [vmem:[%s3033_s24 + $0x60] sm:$0xff] }
  0x17   : > { %2867 = vset.pattern.permute.xlu0 %v2978_v1  ;;  %512 = vperm.xlu1 %2852, %v282_v4  }
  0x18   : > { %721 = vperm.xlu0 %2867, %v286_v5   ;;  %705 = vperm.xlu2 %2853, %v282_v4  }
  0x1f   : > { %2854 = vset.pattern.permute.xlu1 %v2979_v6 }
  0x20   : > { %2868 = vset.pattern.permute.xlu0 %v2979_v6  ;;  %898 = vperm.xlu1 %2854, %v282_v4  }
  0x21   : > { %894 = vperm.xlu0 %2868, %v281_v3   ;;  %2855 = vset.pattern.permute.xlu2 %v2980_v8 }
  0x22   : > { %326 = vperm.xlu2 %2855, %v283_v7  }
  0x28   : > { %2856 = vset.pattern.permute.xlu1 %v2980_v8 }
  0x29   : > { %922 = vperm.xlu0 %2868, %v288_v9   ;;  %331 = vperm.xlu1 %2856, %v284_v2  }
  0x2a   : > { %2857 = vset.pattern.permute.xlu2 %v2977_v0 }
  0x2b   : > { %516 = vperm.xlu2 %2857, %v283_v7  }
  0x31   : > { %934 = vperm.xlu0 %2868, %v3048_v10   ;;  %2859 = vset.pattern.permute.xlu1 %v2978_v1 }
  0x32   : > { %709 = vperm.xlu1 %2859, %v283_v7  }
  0x33   : > { %2860 = vset.pattern.permute.xlu2 %v2978_v1 }
  0x34   : > { %713 = vperm.xlu2 %2860, %v284_v2  }
  0x39   : > { %2889 = vset.pattern.permute.xlu0 %v2980_v8 }
  0x3a   : > { %316 = vperm.xlu0 %2889, %v281_v3   ;;  %2861 = vset.pattern.permute.xlu1 %v2979_v6 }
  0x3b   : > { %902 = vperm.xlu1 %2861, %v283_v7  }
  0x3c   : > { %2862 = vset.pattern.permute.xlu2 %v2979_v6 }
  0x3d   : > { %906 = vperm.xlu2 %2862, %v284_v2  }
  0x42   : > { %321 = vperm.xlu0 %2889, %v282_v4  }
  0x43   : > { %2863 = vset.pattern.permute.xlu1 %v2980_v8 }
  0x44   : > { %341 = vperm.xlu1 %2863, %v286_v5  }
  0x45   : > { %2864 = vset.pattern.permute.xlu2 %v2977_v0 }
  0x46   : > { %524 = vperm.xlu2 %2864, %v285_v11  }
  0x4a   : > { %336 = vperm.xlu0 %2889, %v285_v11  }
  0x4c   : > { %2865 = vset.pattern.permute.xlu1 %v2977_v0 }
  0x4d   : > { %528 = vperm.xlu1 %2865, %v286_v5  }
  0x4e   : > { %2866 = vset.pattern.permute.xlu2 %v2978_v1 }
  0x4f   : > { %717 = vperm.xlu2 %2866, %v285_v11  }
  0x52   : > { %371 = vperm.xlu0 %2889, %v3062_v12  }
  0x55   : > { %2869 = vset.pattern.permute.xlu1 %v2979_v6 }
  0x56   : > { %910 = vperm.xlu1 %2869, %v285_v11  }
  0x57   : > { %2870 = vset.pattern.permute.xlu2 %v2979_v6 }
  0x58   : > { %914 = vperm.xlu2 %2870, %v286_v5  }
  0x5a   : > { %396 = vperm.xlu0 %2889, %v3067_v13  }
  0x5e   : > { %2871 = vset.pattern.permute.xlu1 %v2980_v8 }
  0x5f   : > { %346 = vperm.xlu1 %2871, %v287_v14  }
  0x60   : > { %2872 = vset.pattern.permute.xlu2 %v2980_v8 }
  0x61   : > { %351 = vperm.xlu2 %2872, %v288_v9  }
  0x62   : > { %2898 = vset.pattern.permute.xlu0 %v2977_v0 }
  0x63   : > { %532 = vperm.xlu0 %2898, %v287_v14  }
  0x67   : > { %2873 = vset.pattern.permute.xlu1 %v2977_v0 }
  0x68   : > { %536 = vperm.xlu1 %2873, %v288_v9  }
  0x69   : > { %2874 = vset.pattern.permute.xlu2 %v2978_v1 }
  0x6a   : > { %725 = vperm.xlu2 %2874, %v287_v14   ;;  %v3080_v16 = vpop.permute.xlu2 %701 }
  0x6b   : > { %560 = vperm.xlu0 %2898, %v3077_v15   ;;  %v829_v2 = vmul.f32 %v3131_v39, %v3080_v16 }
  0x70   : > { %2875 = vset.pattern.permute.xlu1 %v2978_v1 }
  0x71   : > { %729 = vperm.xlu1 %2875, %v288_v9  }
  0x72   : > { %2876 = vset.pattern.permute.xlu2 %v2979_v6  ;;  %v3088_v18 = vpop.permute.xlu2 %705 }
  0x73   : > { %918 = vperm.xlu2 %2876, %v287_v14   ;;  %604 = vperm.xlu0 %2898, %v3085_v17   ;;  %v830_v16 = vmul.f32 %v3131_v39, %v3088_v18 }
  0x79   : > { %2877 = vset.pattern.permute.xlu1 %v2980_v8 }
  0x7a   : > { %356 = vperm.xlu1 %2877, %v289_v19  }
  0x7b   : > { %2878 = vset.pattern.permute.xlu2 %v2980_v8  ;;  %2913 = vset.pattern.permute.xlu0 %v2978_v1 }
  0x7c   : > { %361 = vperm.xlu2 %2878, %v290_v20   ;;  %733 = vperm.xlu0 %2913, %v289_v19   ;;  %v327_v21 = vpop.permute.xlu2 %326 }
  0x7d   : > { %v477_v45 = vmul.f32 %v3117_v34, %v327_v21 }
  0x81   : > { %v509_v22 = vpop.permute.xlu1 %508  ;;  %v521_v23 = vpop.permute.xlu0 %520 }
  0x82   : > { %2879 = vset.pattern.permute.xlu1 %v2977_v0  ;;  %v639_v36 = vmul.f32 %v3121_v35, %v521_v23  ;;  %v636_v54 = vmul.f32 %v3121_v35, %v509_v22  ;;  %v3169_v23 = vld [vmem:[%s3033_s24 + $0x90] sm:$0xff] }
  0x83   : > { %540 = vperm.xlu1 %2879, %v289_v19  }
  0x84   : > { %2880 = vset.pattern.permute.xlu2 %v2977_v0  ;;  %769 = vperm.xlu0 %2913, %v3152_v57  }
  0x85   : > { %544 = vperm.xlu2 %2880, %v290_v20   ;;  %v517_v24 = vpop.permute.xlu2 %516 }
  0x86   : > { %v638_v46 = vmul.f32 %v3121_v35, %v517_v24 }
  0x88   : > { %v670_v51 = vadd.f32 %v638_v46, %v477_v45 }
  0x89   : > { %v3098_v25 = vpop.permute.xlu1 %512 }
  0x8a   : > { %v3100_v26 = vpop.permute.xlu0 %721 }
  0x8b   : > { %2881 = vset.pattern.permute.xlu1 %v2978_v1 }
  0x8c   : > { %737 = vperm.xlu1 %2881, %v290_v20   ;;  %773 = vperm.xlu0 %2913, %v3169_v23  }
  0x8d   : > { %2882 = vset.pattern.permute.xlu2 %v2979_v6 }
  0x8e   : > { %926 = vperm.xlu2 %2882, %v289_v19   ;;  %v714_v27 = vpop.permute.xlu2 %713 }
  0x8f   : > { %v832_v41 = vmul.f32 %v3131_v39, %v714_v27 }
  0x92   : > { %v3104_v28 = vpop.permute.xlu1 %898 }
  0x93   : > { %v895_v29 = vpop.permute.xlu0 %894  ;;  %v1023_v24 = vmul.f32 %v3137_v44, %v3104_v28 }
  0x94   : > { %2883 = vset.pattern.permute.xlu1 %v2979_v6  ;;  %v1022_v5 = vmul.f32 %v3137_v44, %v895_v29  ;;  %2922 = vset.pattern.permute.xlu0 %v2979_v6 }
  0x95   : > { %930 = vperm.xlu1 %2883, %v290_v20   ;;  %958 = vperm.xlu0 %2922, %v3067_v13  }
  0x96   : > { %2884 = vset.pattern.permute.xlu2 %v2980_v8 }
  0x97   : > { %366 = vperm.xlu2 %2884, %v3048_v10   ;;  %v907_v30 = vpop.permute.xlu2 %906 }
  0x98   : > { %v1025_v47 = vmul.f32 %v3137_v44, %v907_v30 }
  0x9b   : > { %v332_v32 = vpop.permute.xlu1 %331  ;;  %v3114_v33 = vpop.permute.xlu0 %922 }
  0x9c   : > { %v478_v37 = vmul.f32 %v3117_v34, %v332_v32 }
  0x9d   : > { %2885 = vset.pattern.permute.xlu1 %v2977_v0 }
  0x9e   : > { %548 = vperm.xlu1 %2885, %v3048_v10   ;;  %v671_v42 = vadd.f32 %v639_v36, %v478_v37 }
  0x9f   : > { %2886 = vset.pattern.permute.xlu2 %v2977_v0 }
  0xa0   : > { %552 = vperm.xlu2 %2886, %v3062_v12   ;;  %v3128_v38 = vpop.permute.xlu2 %524  ;;  %v864_v48 = vadd.f32 %v832_v41, %v671_v42  ;;  %v834_v42 = vmul.f32 %v3131_v39, %v3100_v26 }
  0xa1   : > { %v640_v45 = vmul.f32 %v3121_v35, %v3128_v38 }
  0xa2   : > { %v1057_v53 = vadd.f32 %v1025_v47, %v864_v48 }
  0xa3   : > { %v3133_v40 = vpop.permute.xlu0 %934 }
  0xa4   : > { %v710_v43 = vpop.permute.xlu1 %709  ;;  %v1089_v63 = vpack.c.bf16 %v1057_v53, %v1057_v53 }
  0xa5   : > { %v831_v50 = vmul.f32 %v3131_v39, %v710_v43 }
  0xa6   : > { %2887 = vset.pattern.permute.xlu1 %v2978_v1  ;;  %v1155_v11 = vunpack.c.l.b16 %v1089_v63 }
  0xa7   : > { %741 = vperm.xlu1 %2887, %v3048_v10   ;;  %v863_v58 = vadd.f32 %v831_v50, %v670_v51 }
  0xa8   : > { %2888 = vset.pattern.permute.xlu2 %v2978_v1 }
  0xa9   : > { %745 = vperm.xlu2 %2888, %v3062_v12   ;;  %v3146_v49 = vpop.permute.xlu2 %717 }
  0xac   : > { %v317_v52 = vpop.permute.xlu0 %316 }
  0xad   : > { %v475_v55 = vmul.f32 %v3117_v34, %v317_v52  ;;  %v903_v56 = vpop.permute.xlu1 %902  ;;  %v833_v52 = vmul.f32 %v3131_v39, %v3146_v49 }
  0xae   : > { %v1024_v59 = vmul.f32 %v3137_v44, %v903_v56 }
  0xaf   : > { %v668_v60 = vadd.f32 %v636_v54, %v475_v55  ;;  %2890 = vset.pattern.permute.xlu1 %v2979_v6 }
  0xb0   : > { %938 = vperm.xlu1 %2890, %v3062_v12   ;;  %v1056_v62 = vadd.f32 %v1024_v59, %v863_v58  ;;  %v637_v12 = vmul.f32 %v3121_v35, %v3098_v25 }
  0xb1   : > { %2891 = vset.pattern.permute.xlu2 %v2980_v8  ;;  %v861_v7 = vadd.f32 %v829_v2, %v668_v60 }
  0xb2   : > { %v1088_v3 = vpack.c.bf16 %v1056_v62, %v1056_v62  ;;  %376 = vperm.xlu2 %2891, %v293_v61   ;;  %v915_v4 = vpop.permute.xlu2 %914 }
  0xb3   : > { %v1054_v22 = vadd.f32 %v1022_v5, %v861_v7  ;;  %v1027_v26 = vmul.f32 %v3137_v44, %v915_v4  ;;  %v3201_v4 = vld [vmem:[%s3033_s24 + $0x78] sm:$0xff] }
  0xb4   : > { %v322_v9 = vpop.permute.xlu0 %321  ;;  %v1154_v10 = vunpack.c.l.b16 %v1088_v3  ;;  %954 = vperm.xlu0 %2922, %v3201_v4  }
  0xb5   : > { %v476_v14 = vmul.f32 %v3117_v34, %v322_v9  ;;  %v1086_v18 = vpack.c.bf16 %v1054_v22, %v1054_v22 }
  0xb6   : > { %v342_v19 = vpop.permute.xlu1 %341  ;;  %v1156_v20 = vpack.c.b16 %v1155_v11, %v1154_v10 }
  0xb7   : > { %v669_v21 = vadd.f32 %v637_v12, %v476_v14  ;;  %v1125_v37 = vunpack.c.l.b16 %v1086_v18  ;;  %v480_v28 = vmul.f32 %v3117_v34, %v342_v19 }
  0xb8   : > { %2892 = vset.pattern.permute.xlu1 %v2980_v8  ;;  %1168 = vmatpush.bf16.msra.mxu1 %v1156_v20 }
  0xb9   : > { %v862_v27 = vadd.f32 %v830_v16, %v669_v21  ;;  %381 = vperm.xlu1 %2892, %v3077_v15  }
  0xba   : > { %2893 = vset.pattern.permute.xlu2 %v2977_v0 }
  0xbb   : > { %556 = vperm.xlu2 %2893, %v293_v61   ;;  %v1055_v25 = vadd.f32 %v1023_v24, %v862_v27  ;;  %v352_v29 = vpop.permute.xlu2 %351  ;;  %v295_v27 = vld [vmem:[%s3033_s24 + $0x70] sm:$0xff] }
  0xbc   : > { %v337_v30 = vpop.permute.xlu0 %336  ;;  %v482_v20 = vmul.f32 %v3117_v34, %v352_v29 }
  0xbd   : > { %v1087_v32 = vpack.c.bf16 %v1055_v25, %v1055_v25  ;;  %v479_v46 = vmul.f32 %v3117_v34, %v337_v30  ;;  %v1029_v25 = vmul.f32 %v3137_v44, %v3114_v33 }
  0xbf   : > { %v529_v36 = vpop.permute.xlu1 %528  ;;  %v1126_v41 = vunpack.c.l.b16 %v1087_v32  ;;  %v672_v53 = vadd.f32 %v640_v45, %v479_v46 }
  0xc0   : > { %v641_v43 = vmul.f32 %v3121_v35, %v529_v36 }
  0xc1   : > { %2894 = vset.pattern.permute.xlu1 %v2978_v1  ;;  %v1127_v47 = vpack.c.b16 %v1126_v41, %v1125_v37  ;;  %v865_v56 = vadd.f32 %v833_v52, %v672_v53 }
  0xc2   : > { %v673_v48 = vadd.f32 %v641_v43, %v480_v28  ;;  %749 = vperm.xlu1 %2894, %v293_v61  }
  0xc3   : > { %1140 = vmatpush.bf16.msra.mxu0 %v1127_v47  ;;  %2895 = vset.pattern.permute.xlu2 %v2978_v1 }
  0xc4   : > { %v3189_v50 = vpop.permute.xlu0 %371  ;;  %753 = vperm.xlu2 %2895, %v3077_v15   ;;  %v726_v38 = vpop.permute.xlu2 %725  ;;  %v866_v51 = vadd.f32 %v834_v42, %v673_v48  ;;  %v306_v48 = vld [vmem:[%s3033_s24 + $0xc8] sm:$0xff] }
  0xc5   : > { %v835_v12 = vmul.f32 %v3131_v39, %v726_v38  ;;  %994 = vperm.xlu0 %2922, %v306_v48  }
  0xc6   : > { %v1059_v54 = vadd.f32 %v1027_v26, %v866_v51 }
  0xc8   : > { %v911_v55 = vpop.permute.xlu1 %910  ;;  %v1091_v60 = vpack.c.bf16 %v1059_v54, %v1059_v54 }
  0xc9   : > { %v1026_v58 = vmul.f32 %v3137_v44, %v911_v55 }
  0xca   : > { %2896 = vset.pattern.permute.xlu1 %v2979_v6  ;;  %v1183_v3 = vunpack.c.l.b16 %v1091_v60 }
  0xcb   : > { %942 = vperm.xlu1 %2896, %v293_v61   ;;  %v1058_v59 = vadd.f32 %v1026_v58, %v865_v56 }
  0xcc   : > { %v3196_v62 = vpop.permute.xlu0 %396  ;;  %2897 = vset.pattern.permute.xlu2 %v2979_v6 }
  0xcd   : > { %v1090_v63 = vpack.c.bf16 %v1058_v59, %v1058_v59  ;;  %946 = vperm.xlu2 %2897, %v3077_v15   ;;  %v919_v49 = vpop.permute.xlu2 %918 }
  0xce   : > { %v1028_v21 = vmul.f32 %v3137_v44, %v919_v49 }
  0xcf   : > { %v1182_v2 = vunpack.c.l.b16 %v1090_v63 }
  0xd1   : > { %v347_v5 = vpop.permute.xlu1 %346  ;;  %v1184_v7 = vpack.c.b16 %v1183_v3, %v1182_v2 }
  0xd2   : > { %v481_v10 = vmul.f32 %v3117_v34, %v347_v5 }
  0xd3   : > { %2899 = vset.pattern.permute.xlu1 %v2980_v8  ;;  %1196 = vmatpush.bf16.msra.mxu2 %v1184_v7 }
  0xd4   : > { %401 = vperm.xlu1 %2899, %v3152_v57  }
  0xd5   : > { %v533_v61 = vpop.permute.xlu0 %532  ;;  %2900 = vset.pattern.permute.xlu2 %v2977_v0 }
  0xd6   : > { %572 = vperm.xlu2 %2900, %v3067_v13   ;;  %v362_v15 = vpop.permute.xlu2 %361  ;;  %v642_v9 = vmul.f32 %v3121_v35, %v533_v61 }
  0xd8   : > { %v674_v14 = vadd.f32 %v642_v9, %v481_v10  ;;  %v2793_v9 = vld [vmem:[%s3252_s30 + $0x8] sm:$0xff] }
  0xd9   : > { %2638 = vmatmul.msk.bf16.vlgmr.msra.gmra.mxu1 %vm1129_vm0, %v2793_v9 }
  0xda   : > { %v537_v11 = vpop.permute.xlu1 %536  ;;  %v867_v16 = vadd.f32 %v835_v12, %v674_v14 }
  0xdb   : > { %v643_v22 = vmul.f32 %v3121_v35, %v537_v11 }
  0xdc   : > { %2901 = vset.pattern.permute.xlu1 %v2977_v0  ;;  %v1060_v18 = vadd.f32 %v1028_v21, %v867_v16 }
  0xdd   : > { %576 = vperm.xlu1 %2901, %v3152_v57   ;;  %v675_v30 = vadd.f32 %v643_v22, %v482_v20  ;;  %v3223_v36 = vpop.permute.xlu0 %560 }
  0xde   : > { %2902 = vset.pattern.permute.xlu2 %v2978_v1  ;;  %v1092_v37 = vpack.c.bf16 %v1060_v18, %v1060_v18 }
  0xdf   : > { %765 = vperm.xlu2 %2902, %v3067_v13   ;;  %v545_v19 = vpop.permute.xlu2 %544 }
  0xe0   : > { %v1210_v28 = vunpack.c.l.b16 %v1092_v37  ;;  %v645_v58 = vmul.f32 %v3121_v35, %v545_v19 }
  0xe3   : > { %v730_v24 = vpop.permute.xlu1 %729 }
  0xe4   : > { %v836_v32 = vmul.f32 %v3131_v39, %v730_v24 }
  0xe5   : > { %2903 = vset.pattern.permute.xlu1 %v2980_v8  ;;  %v3229_v46 = vpop.permute.xlu0 %604 }
  0xe6   : > { %v868_v13 = vadd.f32 %v836_v32, %v675_v30  ;;  %386 = vperm.xlu1 %2903, %v295_v27   ;;  %v1032_v32 = vmul.f32 %v3137_v44, %v3133_v40 }
  0xe7   : > { %2904 = vset.pattern.permute.xlu2 %v2980_v8 }
  0xe8   : > { %391 = vperm.xlu2 %2904, %v3201_v4   ;;  %v1061_v29 = vadd.f32 %v1029_v25, %v868_v13  ;;  %v927_v41 = vpop.permute.xlu2 %926  ;;  %v486_v25 = vmul.f32 %v3117_v34, %v3189_v50  ;;  %v3277_v50 = vld [vmem:[%s3033_s24 + $0xa0] sm:$0xff] }
  0xe9   : > { %v1030_v60 = vmul.f32 %v3137_v44, %v927_v41  ;;  %974 = vperm.xlu0 %2922, %v3277_v50  }
  0xea   : > { %v1093_v42 = vpack.c.bf16 %v1061_v29, %v1061_v29 }
  0xec   : > { %v357_v33 = vpop.permute.xlu1 %356  ;;  %v1211_v43 = vunpack.c.l.b16 %v1093_v42 }
  0xed   : > { %v483_v53 = vmul.f32 %v3117_v34, %v357_v33 }
  0xee   : > { %2905 = vset.pattern.permute.xlu1 %v2977_v0  ;;  %v1212_v45 = vpack.c.b16 %v1211_v43, %v1210_v28  ;;  %v734_v52 = vpop.permute.xlu0 %733  ;;  %v300_v43 = vld [vmem:[%s3033_s24 + $0x98] sm:$0xff] }
  0xef   : > { %564 = vperm.xlu1 %2905, %v295_v27   ;;  %v837_v55 = vmul.f32 %v3131_v39, %v734_v52  ;;  %v2792_v52 = vld [vmem:[%s3252_s30] sm:$0xff] }
  0xf0   : > { %1224 = vmatpush.bf16.msrb.mxu1 %v1212_v45  ;;  %2906 = vset.pattern.permute.xlu2 %v2977_v0 }
  0xf1   : > { %568 = vperm.xlu2 %2906, %v3201_v4   ;;  %v367_v47 = vpop.permute.xlu2 %366  ;;  %2935 = vset.pattern.permute.xlu0 %v2977_v0 }
  0xf2   : > { %v485_v21 = vmul.f32 %v3117_v34, %v367_v47  ;;  %2633 = vmatmul.msk.bf16.vlgmr.msra.gmra.mxu0 %vm1129_vm0, %v2792_v52 }
  0xf5   : > { %v541_v26 = vpop.permute.xlu1 %540 }
  0xf6   : > { %v644_v38 = vmul.f32 %v3121_v35, %v541_v26  ;;  %v3287_v26 = vld [vmem:[%s3033_s24 + $0xb8] sm:$0xff] }
  0xf7   : > { %2907 = vset.pattern.permute.xlu1 %v2979_v6  ;;  %600 = vperm.xlu0 %2935, %v3287_v26  }
  0xf8   : > { %962 = vperm.xlu1 %2907, %v3152_v57   ;;  %v676_v54 = vadd.f32 %v644_v38, %v483_v53  ;;  %v484_v57 = vmul.f32 %v3117_v34, %v362_v15 }
  0xf9   : > { %2908 = vset.pattern.permute.xlu2 %v2978_v1 }
  0xfa   : > { %757 = vperm.xlu2 %2908, %v295_v27   ;;  %v553_v51 = vpop.permute.xlu2 %552  ;;  %v869_v59 = vadd.f32 %v837_v55, %v676_v54  ;;  %v677_v2 = vadd.f32 %v645_v58, %v484_v57  ;;  %v649_v55 = vmul.f32 %v3121_v35, %v3223_v36  ;;  %v302_v58 = vld [vmem:[%s3033_s24 + $0xa8] sm:$0xff] }
  0xfb   : > { %v647_v18 = vmul.f32 %v3121_v35, %v553_v51 }
  0xfc   : > { %v1062_v3 = vadd.f32 %v1030_v60, %v869_v59 }
  0xfd   : > { %v679_v37 = vadd.f32 %v647_v18, %v486_v25 }
  0xfe   : > { %v738_v56 = vpop.permute.xlu1 %737  ;;  %v1094_v61 = vpack.c.bf16 %v1062_v3, %v1062_v3 }
  0xff   : > { %v838_v49 = vmul.f32 %v3131_v39, %v738_v56  ;;  %2936 = vset.pattern.permute.xlu0 %v2980_v8 }
 0x100   : > { %2909 = vset.pattern.permute.xlu1 %v2978_v1  ;;  %v1238_v12 = vunpack.c.l.b16 %v1094_v61  ;;  %421 = vperm.xlu0 %2936, %v302_v58  }
 0x101   : > { %761 = vperm.xlu1 %2909, %v3201_v4   ;;  %v870_v7 = vadd.f32 %v838_v49, %v677_v2 }
 0x102   : > { %2910 = vset.pattern.permute.xlu2 %v2979_v6 }
 0x103   : > { %950 = vperm.xlu2 %2910, %v295_v27   ;;  %v746_v63 = vpop.permute.xlu2 %745 }
 0x104   : > { %v840_v41 = vmul.f32 %v3131_v39, %v746_v63 }
 0x106   : > { %v872_v28 = vadd.f32 %v840_v41, %v679_v37  ;;  %v491_v37 = vmul.f32 %v3117_v34, %v3196_v62 }
 0x107   : > { %v931_v5 = vpop.permute.xlu1 %930 }
 0x108   : > { %v1031_v4 = vmul.f32 %v3137_v44, %v931_v5 }
 0x109   : > { %2911 = vset.pattern.permute.xlu1 %v2980_v8 }
 0x10a   : > { %v1063_v15 = vadd.f32 %v1031_v4, %v870_v7  ;;  %436 = vperm.xlu1 %2911, %v3085_v17  }
 0x10b   : > { %2912 = vset.pattern.permute.xlu2 %v2980_v8 }
 0x10c   : > { %v1095_v10 = vpack.c.bf16 %v1063_v15, %v1063_v15  ;;  %441 = vperm.xlu2 %2912, %v306_v48   ;;  %v3258_v11 = vpop.permute.xlu2 %376 }
 0x10d   : > { %v487_v49 = vmul.f32 %v3117_v34, %v3258_v11 }
 0x10e   : > { %v1239_v14 = vunpack.c.l.b16 %v1095_v10 }
 0x110   : > { %v549_v19 = vpop.permute.xlu1 %548  ;;  %v1240_v20 = vpack.c.b16 %v1239_v14, %v1238_v12 }
 0x111   : > { %v646_v22 = vmul.f32 %v3121_v35, %v549_v19 }
 0x112   : > { %2914 = vset.pattern.permute.xlu1 %v2977_v0  ;;  %1252 = vmatpush.bf16.msrb.mxu0 %v1240_v20 }
 0x113   : > { %608 = vperm.xlu1 %2914, %v306_v48   ;;  %v678_v30 = vadd.f32 %v646_v22, %v485_v21 }
 0x114   : > { %2915 = vset.pattern.permute.xlu2 %v2978_v1 }
 0x115   : > { %797 = vperm.xlu2 %2915, %v3085_v17   ;;  %v557_v16 = vpop.permute.xlu2 %556 }
 0x116   : > { %v648_v36 = vmul.f32 %v3121_v35, %v557_v16  ;;  %v3316_v16 = vld [vmem:[%s3252_s30 + $0x10] sm:$0xff] }
 0x117   : > { %2643 = vmatmul.msk.bf16.vlgmr.msra.gmra.mxu2 %vm1129_vm0, %v3316_v16 }
 0x118   : > { %v680_v4 = vadd.f32 %v648_v36, %v487_v49 }
 0x119   : > { %v742_v24 = vpop.permute.xlu1 %741 }
 0x11a   : > { %v839_v27 = vmul.f32 %v3131_v39, %v742_v24 }
 0x11b   : > { %2916 = vset.pattern.permute.xlu1 %v2978_v1 }
 0x11c   : > { %801 = vperm.xlu1 %2916, %v306_v48   ;;  %v871_v13 = vadd.f32 %v839_v27, %v678_v30  ;;  %v770_v27 = vpop.permute.xlu0 %769 }
 0x11d   : > { %2917 = vset.pattern.permute.xlu2 %v2979_v6 }
 0x11e   : > { %990 = vperm.xlu2 %2917, %v3085_v17   ;;  %v754_v29 = vpop.permute.xlu2 %753  ;;  %v1064_v42 = vadd.f32 %v1032_v32, %v871_v13  ;;  %v3330_v13 = vld [vmem:[%s3033_s24 + $0xb0] sm:$0xff] }
 0x11f   : > { %v842_v59 = vmul.f32 %v3131_v39, %v754_v29  ;;  %v2795_v29 = vld [vmem:[%s3252_s30 + $0x18] sm:$0xff] }
 0x120   : > { %v1096_v45 = vpack.c.bf16 %v1064_v42, %v1064_v42  ;;  %2648 = vmatmul.msk.bf16.vlgmr.msrb.gmra.mxu1 %vm1129_vm0, %v2795_v29  ;;  %v3340_v42 = vld [vmem:[%s3033_s24 + $0xd0] sm:$0xff] }
 0x121   : > { %446 = vperm.xlu0 %2936, %v3340_v42  }
 0x122   : > { %v939_v33 = vpop.permute.xlu1 %938  ;;  %v1266_v38 = vunpack.c.l.b16 %v1096_v45 }
 0x123   : > { %v1033_v40 = vmul.f32 %v3137_v44, %v939_v33 }
 0x124   : > { %2918 = vset.pattern.permute.xlu1 %v2980_v8  ;;  %v3326_v30 = vpop.permute.xlu0 %773 }
 0x125   : > { %v1065_v17 = vadd.f32 %v1033_v40, %v872_v28  ;;  %406 = vperm.xlu1 %2918, %v3169_v23  }
 0x126   : > { %2919 = vset.pattern.permute.xlu2 %v2980_v8 }
 0x127   : > { %v1097_v47 = vpack.c.bf16 %v1065_v17, %v1065_v17  ;;  %411 = vperm.xlu2 %2919, %v300_v43   ;;  %v947_v48 = vpop.permute.xlu2 %946 }
 0x128   : > { %v1035_v3 = vmul.f32 %v3137_v44, %v947_v48  ;;  %v846_v48 = vmul.f32 %v3131_v39, %v770_v27  ;;  %v3384_v27 = vld [vmem:[%s3033_s24 + $0xe0] sm:$0xff] }
 0x129   : > { %v1267_v51 = vunpack.c.l.b16 %v1097_v47  ;;  %2945 = vset.pattern.permute.xlu0 %v2978_v1 }
 0x12b   : > { %v1268_v53 = vpack.c.b16 %v1267_v51, %v1266_v38  ;;  %v382_v54 = vpop.permute.xlu1 %381 }
 0x12c   : > { %v488_v56 = vmul.f32 %v3117_v34, %v382_v54 }
 0x12d   : > { %2920 = vset.pattern.permute.xlu1 %v2977_v0  ;;  %1280 = vmatpush.bf16.msra.mxu1 %v1268_v53  ;;  %v3356_v53 = vld [vmem:[%s3252_s30 + $0x20] sm:$0xff] }
 0x12e   : > { %580 = vperm.xlu1 %2920, %v3169_v23   ;;  %v681_v60 = vadd.f32 %v649_v55, %v488_v56  ;;  %v3359_v55 = vld [vmem:[%s3033_s24 + $0xd8] sm:$0xff]  ;;  %2653 = vmatmul.msk.bf16.vlgmr.msrb.gmra.mxu0 %vm1129_vm0, %v3356_v53 }
 0x12f   : > { %2921 = vset.pattern.permute.xlu2 %v2977_v0  ;;  %809 = vperm.xlu0 %2945, %v3359_v55  }
 0x130   : > { %584 = vperm.xlu2 %2921, %v300_v43   ;;  %v573_v57 = vpop.permute.xlu2 %572  ;;  %v874_v2 = vadd.f32 %v842_v59, %v681_v60 }
 0x131   : > { %v652_v41 = vmul.f32 %v3121_v35, %v573_v57 }
 0x132   : > { %v1067_v61 = vadd.f32 %v1035_v3, %v874_v2 }
 0x133   : > { %v684_v33 = vadd.f32 %v652_v41, %v491_v37 }
 0x134   : > { %v750_v63 = vpop.permute.xlu1 %749  ;;  %v1099_v11 = vpack.c.bf16 %v1067_v61, %v1067_v61 }
 0x135   : > { %v841_v7 = vmul.f32 %v3131_v39, %v750_v63 }
 0x136   : > { %2923 = vset.pattern.permute.xlu1 %v2978_v1  ;;  %v1295_v20 = vunpack.c.l.b16 %v1099_v11 }
 0x137   : > { %777 = vperm.xlu1 %2923, %v300_v43   ;;  %v873_v9 = vadd.f32 %v841_v7, %v680_v4  ;;  %2950 = vset.pattern.permute.xlu0 %v2977_v0 }
 0x138   : > { %2924 = vset.pattern.permute.xlu2 %v2979_v6  ;;  %620 = vperm.xlu0 %2950, %v3384_v27  }
 0x139   : > { %966 = vperm.xlu2 %2924, %v3169_v23   ;;  %v766_v5 = vpop.permute.xlu2 %765 }
 0x13a   : > { %v845_v28 = vmul.f32 %v3131_v39, %v766_v5 }
 0x13c   : > { %v877_v45 = vadd.f32 %v845_v28, %v684_v33 }
 0x13d   : > { %v943_v15 = vpop.permute.xlu1 %942 }
 0x13e   : > { %v1034_v10 = vmul.f32 %v3137_v44, %v943_v15 }
 0x13f   : > { %2925 = vset.pattern.permute.xlu1 %v2979_v6 }
 0x140   : > { %v1066_v12 = vadd.f32 %v1034_v10, %v873_v9  ;;  %970 = vperm.xlu1 %2925, %v300_v43   ;;  %v959_v43 = vpop.permute.xlu0 %958  ;;  %2955 = vset.pattern.permute.xlu0 %v2979_v6 }
 0x141   : > { %2926 = vset.pattern.permute.xlu2 %v2980_v8  ;;  %v1038_v47 = vmul.f32 %v3137_v44, %v959_v43  ;;  %v3407_v43 = vld [vmem:[%s3252_s30 + $0x30] sm:$0xff] }
 0x142   : > { %v1098_v14 = vpack.c.bf16 %v1066_v12, %v1066_v12  ;;  %416 = vperm.xlu2 %2926, %v3277_v50   ;;  %v3313_v23 = vpop.permute.xlu2 %391 }
 0x143   : > { %v1070_v54 = vadd.f32 %v1038_v47, %v877_v45  ;;  %v490_v3 = vmul.f32 %v3117_v34, %v3313_v23 }
 0x144   : > { %v1294_v19 = vunpack.c.l.b16 %v1098_v14 }
 0x145   : > { %v1102_v49 = vpack.c.bf16 %v1070_v54, %v1070_v54 }
 0x146   : > { %v402_v21 = vpop.permute.xlu1 %401  ;;  %v1296_v22 = vpack.c.b16 %v1295_v20, %v1294_v19 }
 0x147   : > { %v492_v17 = vmul.f32 %v3117_v34, %v402_v21  ;;  %v1350_v61 = vunpack.c.l.b16 %v1102_v49  ;;  %v3428_v49 = vld [vmem:[%s3033_s24 + $0xf0] sm:$0xff] }
 0x148   : > { %2927 = vset.pattern.permute.xlu1 %v2977_v0  ;;  %1308 = vmatpush.bf16.msrb.mxu2 %v1296_v22  ;;  %v955_v9 = vpop.permute.xlu0 %954 }
 0x149   : > { %588 = vperm.xlu1 %2927, %v3277_v50   ;;  %v1037_v23 = vmul.f32 %v3137_v44, %v955_v9 }
 0x14a   : > { %2928 = vset.pattern.permute.xlu2 %v2977_v0 }
 0x14b   : > { %592 = vperm.xlu2 %2928, %v302_v58   ;;  %v569_v24 = vpop.permute.xlu2 %568  ;;  %2663 = vmatmul.msk.bf16.vlgmr.msrb.gmra.mxu2 %vm1129_vm0, %v3407_v43 }
 0x14c   : > { %v651_v5 = vmul.f32 %v3121_v35, %v569_v24 }
 0x14e   : > { %v683_v14 = vadd.f32 %v651_v5, %v490_v3 }
 0x14f   : > { %v577_v25 = vpop.permute.xlu1 %576 }
 0x150   : > { %v653_v62 = vmul.f32 %v3121_v35, %v577_v25 }
 0x151   : > { %2929 = vset.pattern.permute.xlu1 %v2978_v1 }
 0x152   : > { %781 = vperm.xlu1 %2929, %v3277_v50   ;;  %v685_v38 = vadd.f32 %v653_v62, %v492_v17 }
 0x153   : > { %2930 = vset.pattern.permute.xlu2 %v2978_v1 }
 0x154   : > { %785 = vperm.xlu2 %2930, %v302_v58   ;;  %v758_v18 = vpop.permute.xlu2 %757 }
 0x155   : > { %v843_v60 = vmul.f32 %v3131_v39, %v758_v18 }
 0x158   : > { %v387_v32 = vpop.permute.xlu1 %386 }
 0x159   : > { %v489_v56 = vmul.f32 %v3117_v34, %v387_v32  ;;  %v3388_v32 = vld [vmem:[%s3252_s30 + $0x28] sm:$0xff] }
 0x15a   : > { %2931 = vset.pattern.permute.xlu1 %v2979_v6  ;;  %2658 = vmatmul.msk.bf16.vlgmr.msra.gmra.mxu1 %vm1129_vm0, %v3388_v32 }
 0x15b   : > { %978 = vperm.xlu1 %2931, %v302_v58   ;;  %v878_v58 = vadd.f32 %v846_v48, %v685_v38  ;;  %v995_v38 = vpop.permute.xlu0 %994 }
 0x15c   : > { %2932 = vset.pattern.permute.xlu2 %v2980_v8 }
 0x15d   : > { %426 = vperm.xlu2 %2932, %v3330_v13   ;;  %v951_v50 = vpop.permute.xlu2 %950 }
 0x15e   : > { %v1036_v4 = vmul.f32 %v3137_v44, %v951_v50  ;;  %v660_v50 = vmul.f32 %v3121_v35, %v3229_v46 }
 0x161   : > { %v565_v40 = vpop.permute.xlu1 %564 }
 0x162   : > { %v650_v52 = vmul.f32 %v3121_v35, %v565_v40 }
 0x163   : > { %2933 = vset.pattern.permute.xlu1 %v2980_v8 }
 0x164   : > { %431 = vperm.xlu1 %2933, %v3287_v26   ;;  %v682_v63 = vadd.f32 %v650_v52, %v489_v56 }
 0x165   : > { %2934 = vset.pattern.permute.xlu2 %v2977_v0 }
 0x166   : > { %596 = vperm.xlu2 %2934, %v3330_v13   ;;  %v3352_v51 = vpop.permute.xlu2 %441  ;;  %v875_v7 = vadd.f32 %v843_v60, %v682_v63 }
 0x167   : > { %v500_v46 = vmul.f32 %v3117_v34, %v3352_v51 }
 0x168   : > { %v1068_v19 = vadd.f32 %v1036_v4, %v875_v7  ;;  %v3432_v4 = vld [vmem:[%s3252_s30 + $0x40] sm:$0xff] }
 0x16a   : > { %v963_v57 = vpop.permute.xlu1 %962  ;;  %v1100_v22 = vpack.c.bf16 %v1068_v19, %v1068_v19 }
 0x16b   : > { %v1039_v59 = vmul.f32 %v3137_v44, %v963_v57 }
 0x16c   : > { %2937 = vset.pattern.permute.xlu1 %v2978_v1  ;;  %v1322_v29 = vunpack.c.l.b16 %v1100_v22 }
 0x16d   : > { %v1071_v36 = vadd.f32 %v1039_v59, %v878_v58  ;;  %789 = vperm.xlu1 %2937, %v3330_v13   ;;  %v1047_v59 = vmul.f32 %v3137_v44, %v995_v38  ;;  %v312_v38 = vld [vmem:[%s3033_s24 + $0xf8] sm:$0xff] }
 0x16e   : > { %2938 = vset.pattern.permute.xlu2 %v2978_v1 }
 0x16f   : > { %v1103_v2 = vpack.c.bf16 %v1071_v36, %v1071_v36  ;;  %793 = vperm.xlu2 %2938, %v3287_v26   ;;  %v798_v10 = vpop.permute.xlu2 %797 }
 0x170   : > { %v853_v62 = vmul.f32 %v3131_v39, %v798_v10  ;;  %v3461_v10 = vld [vmem:[%s3904_s2 + $0x28] sm:$0xff] }
 0x171   : > { %v1351_v15 = vunpack.c.l.b16 %v1103_v2 }
 0x173   : > { %v1352_v11 = vpack.c.b16 %v1351_v15, %v1350_v61  ;;  %v762_v12 = vpop.permute.xlu1 %761  ;;  %v3452_v15 = vld [vmem:[%s3904_s2 + $0x30] sm:$0xff] }
 0x174   : > { %v844_v20 = vmul.f32 %v3131_v39, %v762_v12  ;;  %v3472_v12 = vld [vmem:[%s3904_s2 + $0x20] sm:$0xff] }
 0x175   : > { %2939 = vset.pattern.permute.xlu1 %v2979_v6  ;;  %1364 = vmatpush.bf16.msra.mxu0 %v1352_v11 }
 0x176   : > { %v876_v21 = vadd.f32 %v844_v20, %v683_v14  ;;  %982 = vperm.xlu1 %2939, %v3330_v13   ;;  %v3478_v20 = vld [vmem:[%s3252_s30 + $0x60] sm:$0xff] }
 0x177   : > { %2940 = vset.pattern.permute.xlu2 %v2979_v6 }
 0x178   : > { %v1069_v24 = vadd.f32 %v1037_v23, %v876_v21  ;;  %986 = vperm.xlu2 %2940, %v3287_v26   ;;  %v991_v18 = vpop.permute.xlu2 %990  ;;  %v3397_v26 = vld [vmem:[%s3033_s24 + $0xe8] sm:$0xff]  ;;  %2673 = vmatmul.msk.bf16.vlgmr.msra.gmra.mxu0 %vm1129_vm0, %v3432_v4  ;;  %v3484_v23 = vld [vmem:[%s3904_s2 + $0x18] sm:$0xff]  ;;  %v847_v21 = vmul.f32 %v3131_v39, %v3326_v30  ;;  %v3498_v30 = vld [vmem:[%s3904_s2 + $0x10] sm:$0xff] }
 0x179   : > { %1010 = vperm.xlu0 %2955, %v3397_v26   ;;  %v1046_v47 = vmul.f32 %v3137_v44, %v991_v18 }
 0x17a   : > { %v1101_v25 = vpack.c.bf16 %v1069_v24, %v1069_v24 }
 0x17c   : > { %v1323_v37 = vunpack.c.l.b16 %v1101_v25  ;;  %v437_v41 = vpop.permute.xlu1 %436  ;;  %v1142_v25 = vpop.f32.mrf.mxu0 }
 0x17d   : > { %v499_v33 = vmul.f32 %v3117_v34, %v437_v41 }
 0x17e   : > { %v1324_v13 = vpack.c.b16 %v1323_v37, %v1322_v29  ;;  %2941 = vset.pattern.permute.xlu1 %v2980_v8 }
 0x17f   : > { %451 = vperm.xlu1 %2941, %v3359_v55   ;;  %v692_v45 = vadd.f32 %v660_v50, %v499_v33  ;;  %v3504_v50 = vperm.slane %v3112_v31, 4  ;;  %v975_v33 = vpop.permute.xlu0 %974 }
 0x180   : > { %1336 = vmatpush.bf16.msrb.mxu1 %v1324_v13  ;;  %2942 = vset.pattern.permute.xlu2 %v2977_v0 }
 0x181   : > { %612 = vperm.xlu2 %2942, %v3340_v42   ;;  %v3403_v28 = vpop.permute.xlu2 %411  ;;  %v885_v17 = vadd.f32 %v853_v62, %v692_v45  ;;  %2960 = vset.pattern.permute.xlu0 %v2978_v1 }
 0x182   : > { %821 = vperm.xlu0 %2960, %v3428_v49   ;;  %v494_v29 = vmul.f32 %v3117_v34, %v3403_v28  ;;  %v1568_v28 = vadd.f32 %v3504_v50, %v1142_v25 }
 0x183   : > { %v1078_v56 = vadd.f32 %v1046_v47, %v885_v17 }
 0x184   : > { %v1144_v31 = vpop.f32.mrf.mxu0 }
 0x185   : > { %v609_v40 = vpop.permute.xlu1 %608  ;;  %v1110_v60 = vpack.c.bf16 %v1078_v56, %v1078_v56 }
 0x186   : > { %v661_v48 = vmul.f32 %v3121_v35, %v609_v40  ;;  %v3513_v40 = vld [vmem:[%s3904_s2 + $0x8] sm:$0xff] }
 0x187   : > { %2943 = vset.pattern.permute.xlu1 %v2977_v0  ;;  %v1462_v2 = vunpack.c.l.b16 %v1110_v60 }
 0x188   : > { %616 = vperm.xlu1 %2943, %v3359_v55   ;;  %v693_v57 = vadd.f32 %v661_v48, %v500_v46  ;;  %v1569_v48 = vadd.f32 %v3504_v50, %v1144_v31 }
 0x189   : > { %2944 = vset.pattern.permute.xlu2 %v2978_v1 }
 0x18a   : > { %805 = vperm.xlu2 %2944, %v3340_v42   ;;  %v585_v52 = vpop.permute.xlu2 %584  ;;  %2964 = vset.pattern.permute.xlu0 %v2979_v6 }
 0x18b   : > { %v655_v37 = vmul.f32 %v3121_v35, %v585_v52  ;;  %v3523_v52 = vld [vmem:[%s3904_s2] sm:$0xff] }
 0x18d   : > { %v687_v62 = vadd.f32 %v655_v37, %v494_v29 }
 0x18e   : > { %v802_v54 = vpop.permute.xlu1 %801 }
 0x18f   : > { %v854_v58 = vmul.f32 %v3131_v39, %v802_v54 }
 0x190   : > { %2946 = vset.pattern.permute.xlu1 %v2979_v6 }
 0x191   : > { %v886_v51 = vadd.f32 %v854_v58, %v693_v57  ;;  %998 = vperm.xlu1 %2946, %v3340_v42   ;;  %v3437_v42 = vld [vmem:[%s3904_s2 + $0x38] sm:$0xff]  ;;  %v1601_v58 = vmax.f32 %v1569_v48, 0.0 }
 0x192   : > { %2947 = vset.pattern.permute.xlu2 %v2979_v6 }
 0x193   : > { %v1079_v63 = vadd.f32 %v1047_v59, %v886_v51  ;;  %1002 = vperm.xlu2 %2947, %v3359_v55   ;;  %v967_v7 = vpop.permute.xlu2 %966  ;;  %v3445_v55 = vld [vmem:[%s3252_s30 + $0x38] sm:$0xff] }
 0x194   : > { %2668 = vmatmul.msk.bf16.vlgmr.msrb.gmra.mxu1 %vm1129_vm0, %v3445_v55  ;;  %v1040_v13 = vmul.f32 %v3137_v44, %v967_v7 }
 0x195   : > { %v1111_v36 = vpack.c.bf16 %v1079_v63, %v1079_v63 }
 0x197   : > { %v1463_v3 = vunpack.c.l.b16 %v1111_v36  ;;  %v407_v5 = vpop.permute.xlu1 %406  ;;  %v601_v36 = vpop.permute.xlu0 %600 }
 0x198   : > { %v493_v19 = vmul.f32 %v3117_v34, %v407_v5 }
 0x199   : > { %v1464_v61 = vpack.c.b16 %v1463_v3, %v1462_v2  ;;  %2948 = vset.pattern.permute.xlu1 %v2980_v8  ;;  %v1170_v2 = vpop.f32.mrf.mxu1 }
 0x19a   : > { %456 = vperm.xlu1 %2948, %v3384_v27  }
 0x19b   : > { %1476 = vmatpush.bf16.msrb.mxu0 %v1464_v61  ;;  %2949 = vset.pattern.permute.xlu2 %v2980_v8 }
 0x19c   : > { %461 = vperm.xlu2 %2949, %v3397_v26   ;;  %v3463_v11 = vpop.permute.xlu2 %416 }
 0x19d   : > { %v495_v61 = vmul.f32 %v3117_v34, %v3463_v11 }
 0x19e   : > { %2693 = vmatmul.msk.bf16.vlgmr.msrb.gmra.mxu0 %vm1129_vm0, %v3478_v20 }
 0x19f   : > { %1712 = vmatpush.bf16.msra.mxu0 %v3437_v42 }
 0x1a0   : > { %v581_v9 = vpop.permute.xlu1 %580 }
 0x1a1   : > { %v654_v14 = vmul.f32 %v3121_v35, %v581_v9 }
 0x1a2   : > { %2951 = vset.pattern.permute.xlu1 %v2977_v0 }
 0x1a3   : > { %1713 = vmatpush.bf16.msra.mxu0 %v3452_v15  ;;  %624 = vperm.xlu1 %2951, %v3397_v26   ;;  %v686_v22 = vadd.f32 %v654_v14, %v493_v19  ;;  %v1172_v14 = vpop.f32.mrf.mxu1  ;;  %v422_v19 = vpop.permute.xlu0 %421 }
 0x1a4   : > { %2952 = vset.pattern.permute.xlu2 %v2978_v1 }
 0x1a5   : > { %813 = vperm.xlu2 %2952, %v3384_v27   ;;  %v593_v18 = vpop.permute.xlu2 %592  ;;  %v879_v41 = vadd.f32 %v847_v21, %v686_v22  ;;  %v1571_v22 = vadd.f32 %v3504_v50, %v1172_v14 }
 0x1a6   : > { %v657_v37 = vmul.f32 %v3121_v35, %v593_v18  ;;  %v1198_v18 = vpop.f32.mrf.mxu2 }
 0x1a7   : > { %1714 = vmatpush.bf16.msra.mxu0 %v3461_v10  ;;  %v1072_v45 = vadd.f32 %v1040_v13, %v879_v41  ;;  %v1603_v29 = vmax.f32 %v1571_v22, 0.0  ;;  %v496_v41 = vmul.f32 %v3117_v34, %v422_v19 }
 0x1a9   : > { %v778_v24 = vpop.permute.xlu1 %777  ;;  %v1104_v54 = vpack.c.bf16 %v1072_v45, %v1072_v45  ;;  %v689_v45 = vadd.f32 %v657_v37, %v496_v41 }
 0x1ab   : > { %1715 = vmatpush.bf16.msra.mxu0 %v3472_v12  ;;  %2953 = vset.pattern.permute.xlu1 %v2978_v1  ;;  %v1378_v60 = vunpack.c.l.b16 %v1104_v54 }
 0x1ac   : > { %817 = vperm.xlu1 %2953, %v3397_v26   ;;  %v848_v26 = vmul.f32 %v3131_v39, %v778_v24 }
 0x1ad   : > { %2954 = vset.pattern.permute.xlu2 %v2979_v6 }
 0x1ae   : > { %1006 = vperm.xlu2 %2954, %v3384_v27   ;;  %v880_v17 = vadd.f32 %v848_v26, %v687_v62  ;;  %v1600_v27 = vmax.f32 %v1568_v28, 0.0  ;;  %v786_v57 = vpop.permute.xlu2 %785  ;;  %v1042_v28 = vmul.f32 %v3137_v44, %v975_v33  ;;  %v1200_v54 = vpop.f32.mrf.mxu2 }
 0x1af   : > { %1716 = vmatpush.bf16.msra.mxu0 %v3484_v23  ;;  %v850_v62 = vmul.f32 %v3131_v39, %v786_v57 }
 0x1b0   : > { %v1632_v51 = vpack.c.bf16 %v1601_v58, %v1600_v27  ;;  %v3548_v27 = vld [vmem:[%s3252_s30 + $0x48] sm:$0xff]  ;;  %v1573_v58 = vadd.f32 %v3504_v50, %v1200_v54 }
 0x1b2   : > { %v971_v46 = vpop.permute.xlu1 %970 }
 0x1b3   : > { %1717 = vmatpush.bf16.msra.mxu0 %v3498_v30  ;;  %v1041_v47 = vmul.f32 %v3137_v44, %v971_v46 }
 0x1b4   : > { %2956 = vset.pattern.permute.xlu1 %v2980_v8 }
 0x1b5   : > { %v1073_v56 = vadd.f32 %v1041_v47, %v880_v17  ;;  %466 = vperm.xlu1 %2956, %v3428_v49   ;;  %v882_v17 = vadd.f32 %v850_v62, %v689_v45  ;;  %v1572_v47 = vadd.f32 %v3504_v50, %v1198_v18 }
 0x1b6   : > { %2957 = vset.pattern.permute.xlu2 %v2980_v8  ;;  %v1570_v8 = vadd.f32 %v3504_v50, %v1170_v2 }
 0x1b7   : > { %1718 = vmatpush.bf16.msra.mxu0 %v3513_v40  ;;  %v1105_v59 = vpack.c.bf16 %v1073_v56, %v1073_v56  ;;  %471 = vperm.xlu2 %2957, %v312_v38   ;;  %v427_v7 = vpop.permute.xlu2 %426  ;;  %v1604_v57 = vmax.f32 %v1572_v47, 0.0  ;;  %v447_v47 = vpop.permute.xlu0 %446 }
 0x1b8   : > { %v1602_v21 = vmax.f32 %v1570_v8, 0.0  ;;  %v497_v22 = vmul.f32 %v3117_v34, %v427_v7 }
 0x1b9   : > { %v1379_v63 = vunpack.c.l.b16 %v1105_v59 }
 0x1ba   : > { %v1633_v11 = vpack.c.bf16 %v1603_v29, %v1602_v21 }
 0x1bb   : > { %1719 = vmatpush.bf16.msra.mxu0 %v3523_v52  ;;  %v1380_v3 = vpack.c.b16 %v1379_v63, %v1378_v60  ;;  %v589_v5 = vpop.permute.xlu1 %588 }
 0x1bc   : > { %v656_v9 = vmul.f32 %v3121_v35, %v589_v5  ;;  %v1226_v5 = vpop.f32.mrf.mxu1 }
 0x1bd   : > { %2958 = vset.pattern.permute.xlu1 %v2977_v0  ;;  %1392 = vmatpush.bf16.msra.mxu1 %v1380_v3  ;;  %v3554_v3 = vld [vmem:[%s3252_s30 + $0x50] sm:$0xff]  ;;  %v1574_v21 = vadd.f32 %v3504_v50, %v1226_v5 }
 0x1be   : > { %1720 = vmatmul.bf16.vlgmr.msra.gmra.mxu0 %v1632_v51  ;;  %628 = vperm.xlu1 %2958, %v3428_v49  }
 0x1bf   : > { %2959 = vset.pattern.permute.xlu2 %v2977_v0  ;;  %v688_v0 = vadd.f32 %v656_v9, %v495_v61  ;;  %v1606_v37 = vmax.f32 %v1574_v21, 0.0  ;;  %v501_v21 = vmul.f32 %v3117_v34, %v447_v47 }
 0x1c0   : > { %632 = vperm.xlu2 %2959, %v312_v38   ;;  %v597_v26 = vpop.permute.xlu2 %596  ;;  %2678 = vmatmul.msk.bf16.vlgmr.msra.gmra.mxu1 %vm1129_vm0, %v3548_v27 }
 0x1c4   : > { %v782_v24 = vpop.permute.xlu1 %781 }
 0x1c5   : > { %v849_v25 = vmul.f32 %v3131_v39, %v782_v24  ;;  %v658_v24 = vmul.f32 %v3121_v35, %v597_v26  ;;  %v1254_v26 = vpop.f32.mrf.mxu0 }
 0x1c6   : > { %2961 = vset.pattern.permute.xlu1 %v2978_v1  ;;  %v1576_v54 = vadd.f32 %v3504_v50, %v1254_v26 }
 0x1c7   : > { %825 = vperm.xlu1 %2961, %v312_v38   ;;  %v881_v13 = vadd.f32 %v849_v25, %v688_v0  ;;  %v1228_v25 = vpop.f32.mrf.mxu1 }
 0x1c8   : > { %2962 = vset.pattern.permute.xlu2 %v2979_v6  ;;  %v1575_v0 = vadd.f32 %v3504_v50, %v1228_v25 }
 0x1c9   : > { %1014 = vperm.xlu2 %2962, %v3428_v49   ;;  %v1074_v46 = vadd.f32 %v1042_v28, %v881_v13  ;;  %v794_v56 = vpop.permute.xlu2 %793  ;;  %v690_v28 = vadd.f32 %v658_v24, %v497_v22 }
 0x1ca   : > { %v852_v9 = vmul.f32 %v3131_v39, %v794_v56  ;;  %v1607_v13 = vmax.f32 %v1575_v0, 0.0 }
 0x1cb   : > { %v1106_v48 = vpack.c.bf16 %v1074_v46, %v1074_v46 }
 0x1cc   : > { %v1635_v45 = vpack.c.bf16 %v1607_v13, %v1606_v37 }
 0x1cd   : > { %v979_v31 = vpop.permute.xlu1 %978  ;;  %v1406_v59 = vunpack.c.l.b16 %v1106_v48 }
 0x1ce   : > { %1725 = vmatmul.bf16.gmra.mxu0 %v1633_v11  ;;  %v1043_v1 = vmul.f32 %v3137_v44, %v979_v31 }
 0x1cf   : > { %2963 = vset.pattern.permute.xlu1 %v2979_v6  ;;  %v1605_v6 = vmax.f32 %v1573_v58, 0.0  ;;  %v3570_v58 = vld [vmem:[%s3252_s30 + $0x58] sm:$0xff] }
 0x1d0   : > { %v1075_v49 = vadd.f32 %v1043_v1, %v882_v17  ;;  %1018 = vperm.xlu1 %2963, %v312_v38   ;;  %v659_v38 = vmul.f32 %v3121_v35, %v601_v36 }
 0x1d1   : > { %v1634_v2 = vpack.c.bf16 %v1605_v6, %v1604_v57 }
 0x1d2   : > { %v1107_v33 = vpack.c.bf16 %v1075_v49, %v1075_v49  ;;  %v987_v61 = vpop.permute.xlu2 %986 }
 0x1d3   : > { %v1045_v36 = vmul.f32 %v3137_v44, %v987_v61 }
 0x1d4   : > { %v1407_v51 = vunpack.c.l.b16 %v1107_v33 }
 0x1d6   : > { %v1408_v60 = vpack.c.b16 %v1407_v51, %v1406_v59  ;;  %v432_v63 = vpop.permute.xlu1 %431  ;;  %v1256_v59 = vpop.f32.mrf.mxu0  ;;  %v1608_v51 = vmax.f32 %v1576_v54, 0.0  ;;  %v3586_v54 = vld [vmem:[%s3252_s30 + $0x68] sm:$0xff] }
 0x1d7   : > { %v498_v8 = vmul.f32 %v3117_v34, %v432_v63  ;;  %v1577_v6 = vadd.f32 %v3504_v50, %v1256_v59 }
 0x1d8   : > { %1420 = vmatpush.bf16.msra.mxu2 %v1408_v60 }
 0x1d9   : > { %v691_v14 = vadd.f32 %v659_v38, %v498_v8  ;;  %v1609_v60 = vmax.f32 %v1577_v6, 0.0  ;;  %v1282_v8 = vpop.f32.mrf.mxu1 }
 0x1db   : > { %2683 = vmatmul.msk.bf16.vlgmr.msra.gmra.mxu2 %vm1129_vm0, %v3554_v3  ;;  %v884_v29 = vadd.f32 %v852_v9, %v691_v14  ;;  %v613_v11 = vpop.permute.xlu2 %612  ;;  %v1636_v63 = vpack.c.bf16 %v1609_v60, %v1608_v51 }
 0x1dd   : > { %v1077_v62 = vadd.f32 %v1045_v36, %v884_v29  ;;  %v1578_v29 = vadd.f32 %v3504_v50, %v1282_v8 }
 0x1de   : > { %1730 = vmatmul.bf16.gmra.mxu0 %v1634_v2  ;;  %v810_v2 = vpop.permute.xlu0 %809 }
 0x1df   : > { %v790_v19 = vpop.permute.xlu1 %789  ;;  %v1109_v17 = vpack.c.bf16 %v1077_v62, %v1077_v62  ;;  %v856_v14 = vmul.f32 %v3131_v39, %v810_v2 }
 0x1e0   : > { %v851_v41 = vmul.f32 %v3131_v39, %v790_v19  ;;  %v662_v19 = vmul.f32 %v3121_v35, %v613_v11 }
 0x1e1   : > { %v1435_v33 = vunpack.c.l.b16 %v1109_v17 }
 0x1e2   : > { %v883_v46 = vadd.f32 %v851_v41, %v690_v28  ;;  %v694_v37 = vadd.f32 %v662_v19, %v501_v21  ;;  %v1284_v41 = vpop.f32.mrf.mxu1  ;;  %v1610_v28 = vmax.f32 %v1578_v29, 0.0 }
 0x1e3   : > { %v1579_v62 = vadd.f32 %v3504_v50, %v1284_v41 }
 0x1e4   : > { %v806_v48 = vpop.permute.xlu2 %805 }
 0x1e5   : > { %v855_v36 = vmul.f32 %v3131_v39, %v806_v48  ;;  %v1310_v48 = vpop.f32.mrf.mxu2 }
 0x1e6   : > { %v621_v59 = vpop.permute.xlu0 %620 }
 0x1e7   : > { %v887_v11 = vadd.f32 %v855_v36, %v694_v37  ;;  %v664_v6 = vmul.f32 %v3121_v35, %v621_v59 }
 0x1e8   : > { %v983_v18 = vpop.permute.xlu1 %982 }
 0x1e9   : > { %v1044_v7 = vmul.f32 %v3137_v44, %v983_v18 }
 0x1eb   : > { %v1076_v31 = vadd.f32 %v1044_v7, %v883_v46  ;;  %v1611_v46 = vmax.f32 %v1579_v62, 0.0 }
 0x1ed   : > { %v1108_v1 = vpack.c.bf16 %v1076_v31, %v1076_v31  ;;  %v1003_v5 = vpop.permute.xlu2 %1002  ;;  %v1637_v31 = vpack.c.bf16 %v1611_v46, %v1610_v28  ;;  %v1312_v51 = vpop.f32.mrf.mxu2 }
 0x1ee   : > { %1735 = vmatmul.bf16.gmra.mxu0 %v1635_v45  ;;  %v1049_v24 = vmul.f32 %v3137_v44, %v1003_v5  ;;  %v1581_v2 = vadd.f32 %v3504_v50, %v1312_v51  ;;  %v1011_v29 = vpop.permute.xlu0 %1010 }
 0x1ef   : > { %v1434_v49 = vunpack.c.l.b16 %v1108_v1  ;;  %v1051_v36 = vmul.f32 %v3137_v44, %v1011_v29 }
 0x1f1   : > { %v452_v56 = vpop.permute.xlu1 %451  ;;  %v1436_v57 = vpack.c.b16 %v1435_v33, %v1434_v49 }
 0x1f2   : > { %v502_v61 = vmul.f32 %v3117_v34, %v452_v56 }
 0x1f3   : > { %1448 = vmatpush.bf16.msra.mxu3 %v1436_v57  ;;  %v1580_v57 = vadd.f32 %v3504_v50, %v1310_v48 }
 0x1f5   : > { %v1366_v8 = vpop.f32.mrf.mxu0 }
 0x1f6   : > { %2688 = vmatmul.msk.bf16.vlgmr.msra.gmra.mxu3 %vm1129_vm0, %v3570_v58  ;;  %v462_v45 = vpop.permute.xlu2 %461 }
 0x1f7   : > { %v504_v19 = vmul.f32 %v3117_v34, %v462_v45 }
 0x1fa   : > { %v617_v38 = vpop.permute.xlu1 %616 }
 0x1fb   : > { %v663_v9 = vmul.f32 %v3121_v35, %v617_v38  ;;  %v1613_v38 = vmax.f32 %v1581_v2, 0.0 }
 0x1fd   : > { %v695_v22 = vadd.f32 %v663_v9, %v502_v61  ;;  %v1368_v37 = vpop.f32.mrf.mxu0 }
 0x1fe   : > { %1740 = vmatmul.bf16.gmra.mxu0 %v1636_v63  ;;  %v1612_v63 = vmax.f32 %v1580_v57, 0.0  ;;  %v1585_v57 = vadd.f32 %v3504_v50, %v1368_v37 }
 0x1ff   : > { %v888_v25 = vadd.f32 %v856_v14, %v695_v22  ;;  %v814_v56 = vpop.permute.xlu2 %813 }
 0x200   : > { %v857_v61 = vmul.f32 %v3131_v39, %v814_v56  ;;  %v1638_v9 = vpack.c.bf16 %v1613_v38, %v1612_v63  ;;  %v1584_v56 = vadd.f32 %v3504_v50, %v1366_v8  ;;  %v1617_v2 = vmax.f32 %v1585_v57, 0.0 }
 0x201   : > { %v1081_v0 = vadd.f32 %v1049_v24, %v888_v25 }
 0x202   : > { %v1616_v63 = vmax.f32 %v1584_v56, 0.0 }
 0x203   : > { %v999_v13 = vpop.permute.xlu1 %998  ;;  %v1113_v7 = vpack.c.bf16 %v1081_v0, %v1081_v0 }
 0x204   : > { %v1048_v18 = vmul.f32 %v3137_v44, %v999_v13 }
 0x205   : > { %v1491_v1 = vunpack.c.l.b16 %v1113_v7 }
 0x206   : > { %v1080_v26 = vadd.f32 %v1048_v18, %v887_v11 }
 0x208   : > { %v1112_v17 = vpack.c.bf16 %v1080_v26, %v1080_v26  ;;  %v1007_v14 = vpop.permute.xlu2 %1006 }
 0x209   : > { %v1050_v24 = vmul.f32 %v3137_v44, %v1007_v14 }
 0x20a   : > { %v1490_v47 = vunpack.c.l.b16 %v1112_v17 }
 0x20c   : > { %v1492_v49 = vpack.c.b16 %v1491_v1, %v1490_v47  ;;  %v457_v33 = vpop.permute.xlu1 %456 }
 0x20d   : > { %v503_v60 = vmul.f32 %v3117_v34, %v457_v33 }
 0x20e   : > { %1745 = vmatmul.bf16.gmra.mxu0 %v1637_v31  ;;  %1504 = vmatpush.bf16.msrb.mxu1 %v1492_v49  ;;  %v3610_v49 = vld [vmem:[%s3252_s30 + $0x70] sm:$0xff] }
 0x211   : > { %2698 = vmatmul.msk.bf16.vlgmr.msrb.gmra.mxu1 %vm1129_vm0, %v3586_v54  ;;  %v1338_v21 = vpop.f32.mrf.mxu1  ;;  %v472_v26 = vpop.permute.xlu2 %471 }
 0x212   : > { %2824 = vmatpush.bf16.msra.mxu1 %v3437_v42  ;;  %v696_v42 = vadd.f32 %v664_v6, %v503_v60  ;;  %v1582_v13 = vadd.f32 %v3504_v50, %v1338_v21 }
 0x214   : > { %v889_v22 = vadd.f32 %v857_v61, %v696_v42  ;;  %v1614_v18 = vmax.f32 %v1582_v13, 0.0  ;;  %v1640_v42 = vpack.c.bf16 %v1617_v2, %v1616_v63 }
 0x215   : > { %v625_v5 = vpop.permute.xlu1 %624 }
 0x216   : > { %2825 = vmatpush.bf16.msra.mxu1 %v3452_v15  ;;  %v665_v25 = vmul.f32 %v3121_v35, %v625_v5  ;;  %v1082_v0 = vadd.f32 %v1050_v24, %v889_v22  ;;  %v506_v22 = vmul.f32 %v3117_v34, %v472_v26 }
 0x218   : > { %v697_v41 = vadd.f32 %v665_v25, %v504_v19  ;;  %v1114_v45 = vpack.c.bf16 %v1082_v0, %v1082_v0 }
 0x219   : > { %v1340_v62 = vpop.f32.mrf.mxu1 }
 0x21a   : > { %2826 = vmatpush.bf16.msra.mxu1 %v3461_v10  ;;  %v1518_v17 = vunpack.c.l.b16 %v1114_v45  ;;  %v633_v51 = vpop.permute.xlu2 %632 }
 0x21b   : > { %v1478_v31 = vpop.f32.mrf.mxu0  ;;  %v667_v24 = vmul.f32 %v3121_v35, %v633_v51 }
 0x21c   : > { %v1592_v33 = vadd.f32 %v3504_v50, %v1478_v31  ;;  %v3628_v31 = vld [vmem:[%s3252_s30 + $0x78] sm:$0xff] }
 0x21d   : > { %v699_v0 = vadd.f32 %v667_v24, %v506_v22 }
 0x21e   : > { %1750 = vmatmul.bf16.gmra.mxu0 %v1638_v9  ;;  %2827 = vmatpush.bf16.msra.mxu1 %v3472_v12  ;;  %v818_v15 = vpop.permute.xlu1 %817  ;;  %v1583_v12 = vadd.f32 %v3504_v50, %v1340_v62  ;;  %v1624_v59 = vmax.f32 %v1592_v33, 0.0 }
 0x21f   : > { %v858_v10 = vmul.f32 %v3131_v39, %v818_v15 }
 0x220   : > { %v1615_v7 = vmax.f32 %v1583_v12, 0.0 }
 0x221   : > { %v890_v28 = vadd.f32 %v858_v10, %v697_v41 }
 0x222   : > { %2828 = vmatpush.bf16.msra.mxu1 %v3484_v23  ;;  %v1639_v48 = vpack.c.bf16 %v1615_v7, %v1614_v18 }
 0x223   : > { %v1083_v11 = vadd.f32 %v1051_v36, %v890_v28  ;;  %v1015_v21 = vpop.permute.xlu2 %1014 }
 0x224   : > { %v1052_v29 = vmul.f32 %v3137_v44, %v1015_v21 }
 0x225   : > { %v1115_v46 = vpack.c.bf16 %v1083_v11, %v1083_v11 }
 0x226   : > { %2829 = vmatpush.bf16.msra.mxu1 %v3498_v30  ;;  %v1480_v30 = vpop.f32.mrf.mxu0 }
 0x227   : > { %v1519_v1 = vunpack.c.l.b16 %v1115_v46  ;;  %v467_v47 = vpop.permute.xlu1 %466 }
 0x228   : > { %v505_v61 = vmul.f32 %v3117_v34, %v467_v47 }
 0x229   : > { %v1520_v23 = vpack.c.b16 %v1519_v1, %v1518_v17 }
 0x22a   : > { %2830 = vmatpush.bf16.msra.mxu1 %v3513_v40  ;;  %v1593_v40 = vadd.f32 %v3504_v50, %v1480_v30 }
 0x22b   : > { %1532 = vmatpush.bf16.msrb.mxu2 %v1520_v23 }
 0x22c   : > { %v1625_v60 = vmax.f32 %v1593_v40, 0.0 }
 0x22e   : > { %1755 = vmatmul.bf16.gmra.mxu0 %v1639_v48  ;;  %2831 = vmatpush.bf16.msra.mxu1 %v3523_v52  ;;  %v1644_v5 = vpack.c.bf16 %v1625_v60, %v1624_v59  ;;  %v822_v52 = vpop.permute.xlu0 %821 }
 0x22f   : > { %2703 = vmatmul.msk.bf16.vlgmr.msrb.gmra.mxu2 %vm1129_vm0, %v3610_v49  ;;  %v859_v14 = vmul.f32 %v3131_v39, %v822_v52 }
 0x230   : > { %v629_v6 = vpop.permute.xlu1 %628 }
 0x231   : > { %v666_v38 = vmul.f32 %v3121_v35, %v629_v6  ;;  %1780 = vmatmul.bf16.vlgmr.msra.gmra.mxu1 %v1644_v5  ;;  %v2965_v6 = vld [vmem:[%s3252_s30 + $0x8] sm:$0xff] }
 0x233   : > { %v698_v8 = vadd.f32 %v666_v38, %v505_v61 }
 0x235   : > { %v891_v25 = vadd.f32 %v859_v14, %v698_v8 }
 0x237   : > { %v1084_v41 = vadd.f32 %v1052_v29, %v891_v25 }
 0x239   : > { %v826_v19 = vpop.permute.xlu1 %825  ;;  %v1116_v34 = vpack.c.bf16 %v1084_v41, %v1084_v41 }
 0x23a   : > { %v860_v36 = vmul.f32 %v3131_v39, %v826_v19 }
 0x23b   : > { %v1721_v9 = vpop.f32.mrf.mxu0  ;;  %v1546_v7 = vunpack.c.l.b16 %v1116_v34 }
 0x23c   : > { %v1801_v15 = vpack.c.bf16 %v1721_v9, %v1721_v9  ;;  %v892_v62 = vadd.f32 %v860_v36, %v699_v0 }
 0x23d   : > { %v1394_v1 = vpop.f32.mrf.mxu1 }
 0x23e   : > { %1760 = vmatmul.bf16.gmra.mxu0 %v1640_v42  ;;  %v1835_v10 = vunpack.c.l.b16 %v1801_v15  ;;  %v1586_v23 = vadd.f32 %v3504_v50, %v1394_v1 }
 0x240   : > { %v1618_v57 = vmax.f32 %v1586_v23, 0.0 }
 0x242   : > { %v1019_v28 = vpop.permute.xlu1 %1018 }
 0x243   : > { %v1723_v37 = vpop.f32.mrf.mxu0  ;;  %v1053_v45 = vmul.f32 %v3137_v44, %v1019_v28 }
 0x244   : > { %v1802_v13 = vpack.c.bf16 %v1723_v37, %v1723_v37 }
 0x245   : > { %v1085_v18 = vadd.f32 %v1053_v45, %v892_v62  ;;  %v1396_v56 = vpop.f32.mrf.mxu1 }
 0x246   : > { %v1836_v11 = vunpack.c.l.b16 %v1802_v13  ;;  %v1587_v59 = vadd.f32 %v3504_v50, %v1396_v56 }
 0x247   : > { %v1117_v12 = vpack.c.bf16 %v1085_v18, %v1085_v18 }
 0x248   : > { %v1837_v35 = vpack.c.b16 %v1836_v11, %v1835_v10  ;;  %v1619_v51 = vmax.f32 %v1587_v59, 0.0 }
 0x249   : > { %v1547_v26 = vunpack.c.l.b16 %v1117_v12 }
 0x24a   : > { %1846 = vmatpush.bf16.msrb.mxu1 %v1837_v35  ;;  %v1641_v60 = vpack.c.bf16 %v1619_v51, %v1618_v57 }
 0x24b   : > { %v1726_v46 = vpop.f32.mrf.mxu0  ;;  %v1548_v39 = vpack.c.b16 %v1547_v26, %v1546_v7 }
 0x24c   : > { %v1803_v17 = vpack.c.bf16 %v1726_v46, %v1726_v46 }
 0x24d   : > { %1560 = vmatpush.bf16.msrb.mxu3 %v1548_v39 }
 0x24e   : > { %v1855_v47 = vunpack.c.l.b16 %v1803_v17  ;;  %1765 = vmatmul.bf16.gmra.mxu0 %v1641_v60 }
 0x250   : > { %2708 = vmatmul.msk.bf16.vlgmr.msrb.gmra.mxu3 %vm1129_vm0, %v3628_v31 }
 0x253   : > { %v1728_v44 = vpop.f32.mrf.mxu0 }
 0x254   : > { %v1804_v48 = vpack.c.bf16 %v1728_v44, %v1728_v44 }
 0x256   : > { %v1856_v33 = vunpack.c.l.b16 %v1804_v48 }
 0x258   : > { %v1857_v30 = vpack.c.b16 %v1856_v33, %v1855_v47 }
 0x25a   : > { %1866 = vmatpush.bf16.msra.mxu2 %v1857_v30 }
 0x25b   : > { %v1731_v40 = vpop.f32.mrf.mxu0 }
 0x25c   : > { %v1805_v63 = vpack.c.bf16 %v1731_v40, %v1731_v40 }
 0x25d   : > { %2742 = vmatmul.msk.bf16.vlgmr.msra.gmra.mxu2 %vm1129_vm0, %v2965_v6 }
 0x25e   : > { %v1422_v2 = vpop.f32.mrf.mxu2  ;;  %v1875_v38 = vunpack.c.l.b16 %v1805_v63 }
 0x25f   : > { %v1588_v61 = vadd.f32 %v3504_v50, %v1422_v2 }
 0x261   : > { %v1620_v14 = vmax.f32 %v1588_v61, 0.0 }
 0x263   : > { %v1733_v5 = vpop.f32.mrf.mxu0 }
 0x264   : > { %v1806_v52 = vpack.c.bf16 %v1733_v5, %v1733_v5 }
 0x266   : > { %v1876_v42 = vunpack.c.l.b16 %v1806_v52  ;;  %v1424_v8 = vpop.f32.mrf.mxu2 }
 0x267   : > { %v1589_v19 = vadd.f32 %v3504_v50, %v1424_v8 }
 0x268   : > { %v1877_v9 = vpack.c.b16 %v1876_v42, %v1875_v38 }
 0x269   : > { %v1621_v22 = vmax.f32 %v1589_v19, 0.0 }
 0x26a   : > { %1886 = vmatpush.bf16.msra.mxu3 %v1877_v9 }
 0x26b   : > { %v1736_v21 = vpop.f32.mrf.mxu0  ;;  %v1642_v24 = vpack.c.bf16 %v1621_v22, %v1620_v14 }
 0x26c   : > { %v1807_v25 = vpack.c.bf16 %v1736_v21, %v1736_v21 }
 0x26d   : > { %2743 = vmatmul.msk.bf16.vlgmr.msra.gmra.mxu3 %vm1129_vm0, %v3316_v16  ;;  %1770 = vmatmul.bf16.gmra.mxu0 %v1642_v24 }
 0x26e   : > { %v1895_v15 = vunpack.c.l.b16 %v1807_v25 }
 0x273   : > { %v1738_v29 = vpop.f32.mrf.mxu0 }
 0x274   : > { %v1808_v36 = vpack.c.bf16 %v1738_v29, %v1738_v29 }
 0x276   : > { %v1896_v37 = vunpack.c.l.b16 %v1808_v36 }
 0x278   : > { %v1897_v0 = vpack.c.b16 %v1896_v37, %v1895_v15 }
 0x279   : > { %v1450_v10 = vpop.f32.mrf.mxu3 }
 0x27a   : > { %1906 = vmatpush.bf16.msra.mxu1 %v1897_v0  ;;  %v1590_v28 = vadd.f32 %v3504_v50, %v1450_v10 }
 0x27b   : > { %v1741_v41 = vpop.f32.mrf.mxu0 }
 0x27c   : > { %v1809_v13 = vpack.c.bf16 %v1741_v41, %v1741_v41  ;;  %v1622_v18 = vmax.f32 %v1590_v28, 0.0 }
 0x27e   : > { %v1915_v11 = vunpack.c.l.b16 %v1809_v13 }
 0x281   : > { %v1452_v45 = vpop.f32.mrf.mxu3 }
 0x282   : > { %v1591_v16 = vadd.f32 %v3504_v50, %v1452_v45 }
 0x283   : > { %v1743_v62 = vpop.f32.mrf.mxu0 }
 0x284   : > { %v1810_v34 = vpack.c.bf16 %v1743_v62, %v1743_v62  ;;  %v1623_v12 = vmax.f32 %v1591_v16, 0.0 }
 0x286   : > { %v1916_v35 = vunpack.c.l.b16 %v1810_v34  ;;  %v1643_v7 = vpack.c.bf16 %v1623_v12, %v1622_v18 }
 0x288   : > { %v1917_v46 = vpack.c.b16 %v1916_v35, %v1915_v11  ;;  %1775 = vmatmul.bf16.gmra.mxu0 %v1643_v7  ;;  %v2966_v7 = vld [vmem:[%s3252_s30] sm:$0xff] }
 0x28a   : > { %1926 = vmatpush.bf16.msrb.mxu2 %v1917_v46 }
 0x28b   : > { %v1746_v26 = vpop.f32.mrf.mxu0 }
 0x28c   : > { %v1811_v39 = vpack.c.bf16 %v1746_v26, %v1746_v26 }
 0x28d   : > { %2745 = vmatmul.msk.bf16.vlgmr.msrb.gmra.mxu2 %vm1129_vm0, %v3356_v53 }
 0x28e   : > { %v1506_v17 = vpop.f32.mrf.mxu1  ;;  %v1935_v44 = vunpack.c.l.b16 %v1811_v39 }
 0x28f   : > { %v1594_v48 = vadd.f32 %v3504_v50, %v1506_v17 }
 0x291   : > { %v1626_v56 = vmax.f32 %v1594_v48, 0.0 }
 0x293   : > { %v1748_v1 = vpop.f32.mrf.mxu0 }
 0x294   : > { %v1812_v47 = vpack.c.bf16 %v1748_v1, %v1748_v1 }
 0x296   : > { %v1936_v23 = vunpack.c.l.b16 %v1812_v47  ;;  %v1508_v30 = vpop.f32.mrf.mxu1 }
 0x297   : > { %v1595_v57 = vadd.f32 %v3504_v50, %v1508_v30  ;;  %v2967_v30 = vld [vmem:[%s3252_s30 + $0x18] sm:$0xff] }
 0x298   : > { %v1937_v33 = vpack.c.b16 %v1936_v23, %v1935_v44 }
 0x299   : > { %v1627_v40 = vmax.f32 %v1595_v57, 0.0 }
 0x29a   : > { %1946 = vmatpush.bf16.msrb.mxu3 %v1937_v33 }
 0x29b   : > { %v1751_v59 = vpop.f32.mrf.mxu0  ;;  %v1645_v53 = vpack.c.bf16 %v1627_v40, %v1626_v56 }
 0x29c   : > { %v1813_v51 = vpack.c.bf16 %v1751_v59, %v1751_v59 }
 0x29d   : > { %2746 = vmatmul.msk.bf16.vlgmr.msrb.gmra.mxu3 %vm1129_vm0, %v3388_v32  ;;  %1785 = vmatmul.bf16.gmra.mxu1 %v1645_v53 }
 0x29e   : > { %v1955_v60 = vunpack.c.l.b16 %v1813_v51 }
 0x2a3   : > { %v1753_v6 = vpop.f32.mrf.mxu0 }
 0x2a4   : > { %v1814_v63 = vpack.c.bf16 %v1753_v6, %v1753_v6 }
 0x2a6   : > { %v1956_v2 = vunpack.c.l.b16 %v1814_v63 }
 0x2a8   : > { %v1957_v5 = vpack.c.b16 %v1956_v2, %v1955_v60 }
 0x2ab   : > { %v1756_v38 = vpop.f32.mrf.mxu0 }
 0x2ac   : > { %v1815_v52 = vpack.c.bf16 %v1756_v38, %v1756_v38 }
 0x2ae   : > { %v1975_v9 = vunpack.c.l.b16 %v1815_v52  ;;  %v1781_v23 = vpop.f32.mrf.mxu1 }
 0x2af   : > { %v1825_v59 = vpack.c.bf16 %v1781_v23, %v1781_v23 }
 0x2b1   : > { %v2075_v51 = vunpack.c.l.b16 %v1825_v59 }
 0x2b2   : > { %v1534_v42 = vpop.f32.mrf.mxu2 }
 0x2b3   : > { %v1758_v61 = vpop.f32.mrf.mxu0  ;;  %v1596_v21 = vadd.f32 %v3504_v50, %v1534_v42 }
 0x2b4   : > { %v1816_v8 = vpack.c.bf16 %v1758_v61, %v1758_v61 }
 0x2b5   : > { %v1628_v24 = vmax.f32 %v1596_v21, 0.0 }
 0x2b6   : > { %v1976_v14 = vunpack.c.l.b16 %v1816_v8  ;;  %v1783_v57 = vpop.f32.mrf.mxu1 }
 0x2b7   : > { %v1826_v40 = vpack.c.bf16 %v1783_v57, %v1783_v57 }
 0x2b8   : > { %v1977_v19 = vpack.c.b16 %v1976_v14, %v1975_v9 }
 0x2b9   : > { %v2076_v6 = vunpack.c.l.b16 %v1826_v40 }
 0x2ba   : > { %1986 = vmatpush.bf16.msra.mxu2 %v1977_v19  ;;  %v1536_v22 = vpop.f32.mrf.mxu2 }
 0x2bb   : > { %v1761_v32 = vpop.f32.mrf.mxu0  ;;  %v1597_v25 = vadd.f32 %v3504_v50, %v1536_v22  ;;  %v2077_v38 = vpack.c.b16 %v2076_v6, %v2075_v51 }
 0x2bc   : > { %v1817_v15 = vpack.c.bf16 %v1761_v32, %v1761_v32 }
 0x2bd   : > { %2748 = vmatmul.msk.bf16.vlgmr.msra.gmra.mxu2 %vm1129_vm0, %v3445_v55  ;;  %v1629_v29 = vmax.f32 %v1597_v25, 0.0 }
 0x2be   : > { %v1995_v0 = vunpack.c.l.b16 %v1817_v15 }
 0x2bf   : > { %v1646_v36 = vpack.c.bf16 %v1629_v29, %v1628_v24 }
 0x2c1   : > { %1790 = vmatmul.bf16.gmra.mxu1 %v1646_v36  ;;  %v2822_v36 = vld [vmem:[%s3905_s3 + $0x30] sm:$0xff] }
 0x2c3   : > { %v1763_v37 = vpop.f32.mrf.mxu0 }
 0x2c4   : > { %v1818_v41 = vpack.c.bf16 %v1763_v37, %v1763_v37 }
 0x2c6   : > { %v1996_v10 = vunpack.c.l.b16 %v1818_v41 }
 0x2c8   : > { %v1997_v13 = vpack.c.b16 %v1996_v10, %v1995_v0 }
 0x2ca   : > { %2006 = vmatpush.bf16.msra.mxu3 %v1997_v13 }
 0x2cb   : > { %v1766_v45 = vpop.f32.mrf.mxu0 }
 0x2cc   : > { %v1819_v1 = vpack.c.bf16 %v1766_v45, %v1766_v45 }
 0x2cd   : > { %2749 = vmatmul.msk.bf16.vlgmr.msra.gmra.mxu3 %vm1129_vm0, %v3432_v4 }
 0x2d3   : > { %v1562_v28 = vpop.f32.mrf.mxu3  ;;  %v1768_v35 = vpop.f32.mrf.mxu0 }
 0x2d4   : > { %v1598_v62 = vadd.f32 %v3504_v50, %v1562_v28  ;;  %v1820_v44 = vpack.c.bf16 %v1768_v35, %v1768_v35  ;;  %v2821_v28 = vld [vmem:[%s3905_s3 + $0x28] sm:$0xff] }
 0x2d6   : > { %v1630_v34 = vmax.f32 %v1598_v62, 0.0  ;;  %v2016_v48 = vunpack.c.l.b16 %v1820_v44 }
 0x2db   : > { %v1564_v11 = vpop.f32.mrf.mxu3 }
 0x2dc   : > { %v1599_v55 = vadd.f32 %v3504_v50, %v1564_v11  ;;  %v2015_v50 = vunpack.c.l.b16 %v1819_v1  ;;  %v2816_v1 = vld [vmem:[%s3905_s3] sm:$0xff] }
 0x2de   : > { %v1631_v18 = vmax.f32 %v1599_v55, 0.0  ;;  %v2017_v33 = vpack.c.b16 %v2016_v48, %v2015_v50 }
 0x2e0   : > { %v1647_v16 = vpack.c.bf16 %v1631_v18, %v1630_v34  ;;  %v2820_v34 = vld [vmem:[%s3905_s3 + $0x20] sm:$0xff] }
 0x2e2   : > { %1795 = vmatmul.bf16.gmra.mxu1 %v1647_v16  ;;  %v2819_v16 = vld [vmem:[%s3905_s3 + $0x18] sm:$0xff] }
 0x2ea   : > { %v1771_v12 = vpop.f32.mrf.mxu0 }
 0x2eb   : > { %v1821_v46 = vpack.c.bf16 %v1771_v12, %v1771_v12 }
 0x2ed   : > { %v2035_v4 = vunpack.c.l.b16 %v1821_v46 }
 0x2f0   : > { %v3684_v24 = vpop.f32.mrf.mxu3 }
 0x2f2   : > { %2741 = vmatmul.msk.bf16.vlgmr.msrb.gmra.mxu1 %vm1129_vm0, %v2966_v7  ;;  %v1773_v26 = vpop.f32.mrf.mxu0  ;;  %v2818_v7 = vld [vmem:[%s3905_s3 + $0x10] sm:$0xff] }
 0x2f3   : > { %1966 = vmatpush.bf16.msrb.mxu1 %v1957_v5  ;;  %v1822_v39 = vpack.c.bf16 %v1773_v26, %v1773_v26 }
 0x2f5   : > { %v2036_v17 = vunpack.c.l.b16 %v1822_v39 }
 0x2f7   : > { %v2037_v47 = vpack.c.b16 %v2036_v17, %v2035_v4 }
 0x2f8   : > { %v3695_v45 = vpop.f32.mrf.mxu3 }
 0x2f9   : > { %2046 = vmatpush.bf16.msrb.mxu2 %v2037_v47 }
 0x2fc   : > { %2751 = vmatmul.msk.bf16.vlgmr.msrb.gmra.mxu2 %vm1129_vm0, %v3554_v3 }
 0x302   : > { %2744 = vmatmul.msk.bf16.vlgmr.msra.gmra.mxu1 %vm1129_vm0, %v2967_v30 }
 0x303   : > { %2026 = vmatpush.bf16.msra.mxu1 %v2017_v33 }
 0x305   : > { %v1776_v56 = vpop.f32.mrf.mxu0 }
 0x306   : > { %v1823_v53 = vpack.c.bf16 %v1776_v56, %v1776_v56 }
 0x308   : > { %v2055_v63 = vunpack.c.l.b16 %v1823_v53 }
 0x30d   : > { %v1778_v60 = vpop.f32.mrf.mxu0 }
 0x30e   : > { %v1824_v2 = vpack.c.bf16 %v1778_v60, %v1778_v60 }
 0x310   : > { %v2056_v5 = vunpack.c.l.b16 %v1824_v2 }
 0x312   : > { %2747 = vmatmul.msk.bf16.vlgmr.msrb.gmra.mxu1 %vm1129_vm0, %v3407_v43  ;;  %v2057_v3 = vpack.c.b16 %v2056_v5, %v2055_v63  ;;  %v1868_v43 = vpop.f32.mrf.mxu2 }
 0x313   : > { %2086 = vmatpush.bf16.msrb.mxu1 %v2077_v38 }
 0x314   : > { %2066 = vmatpush.bf16.msrb.mxu3 %v2057_v3 }
 0x317   : > { %2752 = vmatmul.msk.bf16.vlgmr.msrb.gmra.mxu3 %vm1129_vm0, %v3570_v58  ;;  %v3675_v58 = vld [vmem:[%s3906_s4] sm:$0xff] }
 0x31a   : > { %v1786_v52 = vpop.f32.mrf.mxu1  ;;  %v1870_v21 = vpop.f32.mrf.mxu2 }
 0x31b   : > { %v1827_v61 = vpack.c.bf16 %v1786_v52, %v1786_v52 }
 0x31d   : > { %v2095_v9 = vunpack.c.l.b16 %v1827_v61 }
 0x320   : > { %v3706_v35 = vpop.f32.mrf.mxu3 }
 0x322   : > { %2750 = vmatmul.msk.bf16.vlgmr.msra.gmra.mxu1 %vm1129_vm0, %v3548_v27  ;;  %v1788_v42 = vpop.f32.mrf.mxu1  ;;  %v3678_v27 = vperm.slane %v3675_v58, 5 }
 0x323   : > { %v1828_v8 = vpack.c.bf16 %v1788_v42, %v1788_v42 }
 0x324   : > { %v2156_v22 = vadd.f32 %v3678_v27, %v1868_v43  ;;  %v2157_v29 = vadd.f32 %v3678_v27, %v1870_v21 }
 0x325   : > { %v2096_v14 = vunpack.c.l.b16 %v1828_v8 }
 0x326   : > { %v2188_v25 = vmax.f32 %v2156_v22, 0.0  ;;  %v2189_v37 = vmax.f32 %v2157_v29, 0.0  ;;  %v2159_v22 = vadd.f32 %v3678_v27, %v3695_v45 }
 0x327   : > { %v2097_v19 = vpack.c.b16 %v2096_v14, %v2095_v9 }
 0x328   : > { %v3690_v41 = vpack.c.bf16 %v2189_v37, %v2188_v25  ;;  %v3717_v17 = vpop.f32.mrf.mxu3  ;;  %v2191_v29 = vmax.f32 %v2159_v22, 0.0 }
 0x329   : > { %2106 = vmatpush.bf16.msra.mxu2 %v2097_v19 }
 0x32c   : > { %2754 = vmatmul.msk.bf16.vlgmr.msra.gmra.mxu2 %vm1129_vm0, %v3586_v54  ;;  %v2823_v54 = vld [vmem:[%s3905_s3 + $0x38] sm:$0xff] }
 0x32d   : > { %2299 = vmatpush.bf16.msrb.mxu2 %v2823_v54 }
 0x331   : > { %2300 = vmatpush.bf16.msrb.mxu2 %v2822_v36 }
 0x332   : > { %2753 = vmatmul.msk.bf16.vlgmr.msrb.gmra.mxu1 %vm1129_vm0, %v3478_v20  ;;  %v1928_v20 = vpop.f32.mrf.mxu2 }
 0x333   : > { %v2162_v18 = vadd.f32 %v3678_v27, %v1928_v20 }
 0x335   : > { %2301 = vmatpush.bf16.msrb.mxu2 %v2821_v28  ;;  %v2194_v12 = vmax.f32 %v2162_v18, 0.0 }
 0x339   : > { %2302 = vmatpush.bf16.msrb.mxu2 %v2820_v34 }
 0x33a   : > { %v1930_v11 = vpop.f32.mrf.mxu2 }
 0x33b   : > { %v2163_v46 = vadd.f32 %v3678_v27, %v1930_v11 }
 0x33d   : > { %2303 = vmatpush.bf16.msrb.mxu2 %v2819_v16  ;;  %v2195_v26 = vmax.f32 %v2163_v46, 0.0 }
 0x33e   : > { %v1791_v32 = vpop.f32.mrf.mxu1 }
 0x33f   : > { %v1829_v15 = vpack.c.bf16 %v1791_v32, %v1791_v32  ;;  %v3712_v39 = vpack.c.bf16 %v2195_v26, %v2194_v12 }
 0x341   : > { %v2115_v10 = vunpack.c.l.b16 %v1829_v15  ;;  %2304 = vmatpush.bf16.msrb.mxu2 %v2818_v7 }
 0x342   : > { %v1988_v4 = vpop.f32.mrf.mxu2 }
 0x343   : > { %v2168_v50 = vadd.f32 %v3678_v27, %v1988_v4 }
 0x345   : > { %v2200_v33 = vmax.f32 %v2168_v50, 0.0 }
 0x346   : > { %v1793_v0 = vpop.f32.mrf.mxu1 }
 0x347   : > { %v1830_v13 = vpack.c.bf16 %v1793_v0, %v1793_v0 }
 0x349   : > { %v2116_v62 = vunpack.c.l.b16 %v1830_v13 }
 0x34a   : > { %v1990_v44 = vpop.f32.mrf.mxu2 }
 0x34b   : > { %v2117_v55 = vpack.c.b16 %v2116_v62, %v2115_v10  ;;  %v2169_v48 = vadd.f32 %v3678_v27, %v1990_v44 }
 0x34d   : > { %2126 = vmatpush.bf16.msra.mxu3 %v2117_v55  ;;  %v2201_v30 = vmax.f32 %v2169_v48, 0.0  ;;  %v2164_v48 = vadd.f32 %v3678_v27, %v3706_v35 }
 0x34f   : > { %v2225_v40 = vpack.c.bf16 %v2201_v30, %v2200_v33 }
 0x350   : > { %2755 = vmatmul.msk.bf16.vlgmr.msra.gmra.mxu3 %vm1129_vm0, %v3610_v49  ;;  %v2817_v49 = vld [vmem:[%s3905_s3 + $0x8] sm:$0xff]  ;;  %v2008_v23 = vpop.f32.mrf.mxu3 }
 0x351   : > { %2832 = vmatpush.bf16.msrb.mxu3 %v2823_v54  ;;  %2305 = vmatpush.bf16.msrb.mxu2 %v2817_v49  ;;  %v2170_v2 = vadd.f32 %v3678_v27, %v2008_v23  ;;  %v2165_v23 = vadd.f32 %v3678_v27, %v3717_v17 }
 0x353   : > { %v2202_v38 = vmax.f32 %v2170_v2, 0.0 }
 0x355   : > { %2833 = vmatpush.bf16.msrb.mxu3 %v2822_v36  ;;  %2306 = vmatpush.bf16.msrb.mxu2 %v2816_v1 }
 0x358   : > { %v2010_v60 = vpop.f32.mrf.mxu3 }
 0x359   : > { %2834 = vmatpush.bf16.msrb.mxu3 %v2821_v28  ;;  %v2171_v5 = vadd.f32 %v3678_v27, %v2010_v60 }
 0x35b   : > { %v2203_v3 = vmax.f32 %v2171_v5, 0.0 }
 0x35d   : > { %2835 = vmatpush.bf16.msrb.mxu3 %v2820_v34  ;;  %v2226_v9 = vpack.c.bf16 %v2203_v3, %v2202_v38 }
 0x35f   : > { %v1796_v47 = vpop.f32.mrf.mxu1 }
 0x360   : > { %v1831_v56 = vpack.c.bf16 %v1796_v47, %v1796_v47 }
 0x361   : > { %2836 = vmatpush.bf16.msrb.mxu3 %v2819_v16 }
 0x362   : > { %v2135_v53 = vunpack.c.l.b16 %v1831_v56 }
 0x365   : > { %2837 = vmatpush.bf16.msrb.mxu3 %v2818_v7 }
 0x367   : > { %v1798_v57 = vpop.f32.mrf.mxu1 }
 0x368   : > { %v1832_v59 = vpack.c.bf16 %v1798_v57, %v1798_v57  ;;  %v2196_v57 = vmax.f32 %v2164_v48, 0.0 }
 0x369   : > { %2838 = vmatpush.bf16.msrb.mxu3 %v2817_v49 }
 0x36a   : > { %v2136_v51 = vunpack.c.l.b16 %v1832_v59  ;;  %v2197_v59 = vmax.f32 %v2165_v23, 0.0 }
 0x36c   : > { %v2137_v6 = vpack.c.b16 %v2136_v51, %v2135_v53  ;;  %v2223_v51 = vpack.c.bf16 %v2197_v59, %v2196_v57 }
 0x36d   : > { %2839 = vmatpush.bf16.msrb.mxu3 %v2816_v1 }
 0x36e   : > { %2146 = vmatpush.bf16.msra.mxu1 %v2137_v6 }
 0x36f   : > { %v1848_v63 = vpop.f32.mrf.mxu1 }
 0x370   : > { %2342 = vmatmul.bf16.vlgmr.msrb.gmra.mxu3 %v2225_v40  ;;  %v2154_v52 = vadd.f32 %v3678_v27, %v1848_v63 }
 0x371   : > { %2756 = vmatmul.msk.bf16.vlgmr.msra.gmra.mxu1 %vm1129_vm0, %v3628_v31  ;;  %v2158_v31 = vadd.f32 %v3678_v27, %v3684_v24 }
 0x372   : > { %v2186_v8 = vmax.f32 %v2154_v52, 0.0 }
 0x373   : > { %v2190_v25 = vmax.f32 %v2158_v31, 0.0 }
 0x375   : > { %v2220_v10 = vpack.c.bf16 %v2191_v29, %v2190_v25 }
 0x377   : > { %v1850_v61 = vpop.f32.mrf.mxu1 }
 0x378   : > { %v2155_v42 = vadd.f32 %v3678_v27, %v1850_v61 }
 0x37a   : > { %v2187_v14 = vmax.f32 %v2155_v42, 0.0 }
 0x37c   : > { %v2218_v19 = vpack.c.bf16 %v2187_v14, %v2186_v8 }
 0x37e   : > { %2307 = vmatmul.bf16.vlgmr.msrb.gmra.mxu2 %v2218_v19 }
 0x37f   : > { %v1908_v43 = vpop.f32.mrf.mxu1  ;;  %v2048_v45 = vpop.f32.mrf.mxu2 }
 0x380   : > { %2347 = vmatmul.bf16.gmra.mxu3 %v2226_v9  ;;  %v2160_v24 = vadd.f32 %v3678_v27, %v1908_v43  ;;  %v2174_v26 = vadd.f32 %v3678_v27, %v2048_v45 }
 0x382   : > { %v2192_v34 = vmax.f32 %v2160_v24, 0.0  ;;  %v2206_v1 = vmax.f32 %v2174_v26, 0.0 }
 0x387   : > { %v1910_v21 = vpop.f32.mrf.mxu1  ;;  %v2050_v7 = vpop.f32.mrf.mxu2 }
 0x388   : > { %v2161_v13 = vadd.f32 %v3678_v27, %v1910_v21  ;;  %v2175_v4 = vadd.f32 %v3678_v27, %v2050_v7 }
 0x38a   : > { %v2193_v11 = vmax.f32 %v2161_v13, 0.0  ;;  %v2207_v44 = vmax.f32 %v2175_v4, 0.0 }
 0x38c   : > { %v2221_v12 = vpack.c.bf16 %v2193_v11, %v2192_v34  ;;  %v2228_v47 = vpack.c.bf16 %v2207_v44, %v2206_v1 }
 0x38e   : > { %2312 = vmatmul.bf16.gmra.mxu2 %v3690_v41 }
 0x38f   : > { %v1968_v32 = vpop.f32.mrf.mxu1 }
 0x390   : > { %v2166_v54 = vadd.f32 %v3678_v27, %v1968_v32 }
 0x392   : > { %v2198_v36 = vmax.f32 %v2166_v54, 0.0  ;;  %v3757_v54 = vperm.slane %v3675_v58, 6 }
 0x397   : > { %v1970_v20 = vpop.f32.mrf.mxu1 }
 0x398   : > { %v2167_v15 = vadd.f32 %v3678_v27, %v1970_v20 }
 0x39a   : > { %v2199_v37 = vmax.f32 %v2167_v15, 0.0  ;;  %v2068_v49 = vpop.f32.mrf.mxu3  ;;  %v3761_v15 = vperm.slane %v3675_v58, 7 }
 0x39b   : > { %v2176_v33 = vadd.f32 %v3678_v27, %v2068_v49 }
 0x39c   : > { %v2224_v0 = vpack.c.bf16 %v2199_v37, %v2198_v36 }
 0x39d   : > { %v2208_v40 = vmax.f32 %v2176_v33, 0.0 }
 0x39e   : > { %2317 = vmatmul.bf16.gmra.mxu2 %v2220_v10 }
 0x39f   : > { %v2028_v41 = vpop.f32.mrf.mxu1 }
 0x3a0   : > { %v2172_v28 = vadd.f32 %v3678_v27, %v2028_v41 }
 0x3a2   : > { %v2204_v18 = vmax.f32 %v2172_v28, 0.0  ;;  %v2070_v50 = vpop.f32.mrf.mxu3 }
 0x3a3   : > { %v2177_v30 = vadd.f32 %v3678_v27, %v2070_v50 }
 0x3a5   : > { %v2209_v53 = vmax.f32 %v2177_v30, 0.0 }
 0x3a7   : > { %v2030_v62 = vpop.f32.mrf.mxu1  ;;  %v2229_v6 = vpack.c.bf16 %v2209_v53, %v2208_v40 }
 0x3a8   : > { %v2173_v55 = vadd.f32 %v3678_v27, %v2030_v62 }
 0x3aa   : > { %v2205_v16 = vmax.f32 %v2173_v55, 0.0 }
 0x3ac   : > { %v2227_v46 = vpack.c.bf16 %v2205_v16, %v2204_v18 }
 0x3ae   : > { %2322 = vmatmul.bf16.gmra.mxu2 %v2221_v12  ;;  %2352 = vmatmul.bf16.gmra.mxu3 %v2227_v46 }
 0x3af   : > { %v2088_v56 = vpop.f32.mrf.mxu1  ;;  %v2108_v63 = vpop.f32.mrf.mxu2 }
 0x3b0   : > { %v2178_v60 = vadd.f32 %v3678_v27, %v2088_v56  ;;  %v2180_v3 = vadd.f32 %v3678_v27, %v2108_v63 }
 0x3b2   : > { %v2210_v17 = vmax.f32 %v2178_v60, 0.0  ;;  %v2212_v42 = vmax.f32 %v2180_v3, 0.0 }
 0x3b7   : > { %v2110_v38 = vpop.f32.mrf.mxu2 }
 0x3b8   : > { %v2181_v52 = vadd.f32 %v3678_v27, %v2110_v38 }
 0x3ba   : > { %v2213_v9 = vmax.f32 %v2181_v52, 0.0 }
 0x3bc   : > { %v2231_v8 = vpack.c.bf16 %v2213_v9, %v2212_v42 }
 0x3be   : > { %2327 = vmatmul.bf16.gmra.mxu2 %v3712_v39  ;;  %2357 = vmatmul.bf16.gmra.mxu3 %v2228_v47  ;;  %v2090_v39 = vpop.f32.mrf.mxu1 }
 0x3bf   : > { %v2179_v35 = vadd.f32 %v3678_v27, %v2090_v39 }
 0x3c1   : > { %v2211_v2 = vmax.f32 %v2179_v35, 0.0 }
 0x3c3   : > { %v2230_v5 = vpack.c.bf16 %v2211_v2, %v2210_v17 }
 0x3ce   : > { %2332 = vmatmul.bf16.gmra.mxu2 %v2223_v51  ;;  %2362 = vmatmul.bf16.gmra.mxu3 %v2229_v6 }
 0x3d3   : > { %v2128_v61 = vpop.f32.mrf.mxu3 }
 0x3d4   : > { %v2182_v19 = vadd.f32 %v3678_v27, %v2128_v61 }
 0x3d6   : > { %v2214_v32 = vmax.f32 %v2182_v19, 0.0 }
 0x3db   : > { %v2130_v14 = vpop.f32.mrf.mxu3 }
 0x3dc   : > { %v2183_v43 = vadd.f32 %v3678_v27, %v2130_v14 }
 0x3de   : > { %2337 = vmatmul.bf16.gmra.mxu2 %v2224_v0  ;;  %2367 = vmatmul.bf16.gmra.mxu3 %v2230_v5  ;;  %v2215_v31 = vmax.f32 %v2183_v43, 0.0 }
 0x3e0   : > { %v2232_v22 = vpack.c.bf16 %v2215_v31, %v2214_v32 }
 0x3ee   : > { %2372 = vmatmul.bf16.gmra.mxu3 %v2231_v8  ;;  %v2148_v21 = vpop.f32.mrf.mxu1 }
 0x3ef   : > { %v2184_v36 = vadd.f32 %v3678_v27, %v2148_v21 }
 0x3f1   : > { %v2216_v41 = vmax.f32 %v2184_v36, 0.0 }
 0x3f3   : > { %v2343_v62 = vpop.f32.mrf.mxu3 }
 0x3f4   : > { %v2344_v38 = vadd.f32 %v2343_v62, %v3757_v54 }
 0x3f6   : > { %v2150_v25 = vpop.f32.mrf.mxu1  ;;  %v2402_v42 = vmax.f32 %v2344_v38, 0.0 }
 0x3f7   : > { %v2185_v0 = vadd.f32 %v3678_v27, %v2150_v25 }
 0x3f8   : > { %v2435_v43 = vmul.f32 %v3761_v15, %v2402_v42 }
 0x3f9   : > { %v2217_v13 = vmax.f32 %v2185_v0, 0.0 }
 0x3fb   : > { %v2233_v45 = vpack.c.bf16 %v2217_v13, %v2216_v41  ;;  %v2345_v27 = vpop.f32.mrf.mxu3 }
 0x3fc   : > { %v2346_v14 = vadd.f32 %v2345_v27, %v3757_v54 }
 0x3fe   : > { %2377 = vmatmul.bf16.gmra.mxu3 %v2232_v22  ;;  %v2403_v31 = vmax.f32 %v2346_v14, 0.0 }
 0x400   : > { %v2436_v25 = vmul.f32 %v3761_v15, %v2403_v31 }
 0x401   : > { %v2308_v20 = vpop.f32.mrf.mxu2 }
 0x402   : > { %v2309_v29 = vadd.f32 %v2308_v20, %v3757_v54 }
 0x403   : > { %v2348_v4 = vpop.f32.mrf.mxu3 }
 0x404   : > { %v2388_v37 = vmax.f32 %v2309_v29, 0.0  ;;  %v2349_v29 = vadd.f32 %v2348_v4, %v3757_v54 }
 0x406   : > { %v2421_v10 = vmul.f32 %v3761_v15, %v2388_v37 }
 0x408   : > { %2453 = vadd.xlane.f32.xlu2 %v2421_v10  ;;  %v2404_v10 = vmax.f32 %v2349_v29, 0.0 }
 0x409   : > { %v2310_v24 = vpop.f32.mrf.mxu2 }
 0x40a   : > { %v2311_v28 = vadd.f32 %v2310_v24, %v3757_v54  ;;  %v2437_v24 = vmul.f32 %v3761_v15, %v2404_v10 }
 0x40b   : > { %v2350_v50 = vpop.f32.mrf.mxu3 }
 0x40c   : > { %v2389_v11 = vmax.f32 %v2311_v28, 0.0  ;;  %v2351_v28 = vadd.f32 %v2350_v50, %v3757_v54 }
 0x40e   : > { %2382 = vmatmul.bf16.gmra.mxu3 %v2233_v45  ;;  %v2422_v58 = vmul.f32 %v3761_v15, %v2389_v11 }
 0x410   : > { %2455 = vadd.xlane.f32.xlu0 %v2422_v58  ;;  %v2405_v58 = vmax.f32 %v2351_v28, 0.0 }
 0x411   : > { %v2313_v55 = vpop.f32.mrf.mxu2 }
 0x412   : > { %v2314_v34 = vadd.f32 %v2313_v55, %v3757_v54 }
 0x414   : > { %v2390_v18 = vmax.f32 %v2314_v34, 0.0 }
 0x416   : > { %v2423_v16 = vmul.f32 %v3761_v15, %v2390_v18 }
 0x418   : > { %2457 = vadd.xlane.f32.xlu1 %v2423_v16  ;;  %v2438_v16 = vmul.f32 %v3761_v15, %v2405_v58 }
 0x419   : > { %v2315_v12 = vpop.f32.mrf.mxu2 }
 0x41a   : > { %v2316_v46 = vadd.f32 %v2315_v12, %v3757_v54 }
 0x41c   : > { %v2391_v7 = vmax.f32 %v2316_v46, 0.0 }
 0x41e   : > { %v2424_v26 = vmul.f32 %v3761_v15, %v2391_v7 }
 0x420   : > { %2459 = vadd.xlane.f32.xlu2 %v2424_v26 }
 0x421   : > { %v2318_v49 = vpop.f32.mrf.mxu2 }
 0x422   : > { %v2319_v1 = vadd.f32 %v2318_v49, %v3757_v54 }
 0x424   : > { %v2392_v44 = vmax.f32 %v2319_v1, 0.0 }
 0x426   : > { %v2425_v47 = vmul.f32 %v3761_v15, %v2392_v44 }
 0x428   : > { %2461 = vadd.xlane.f32.xlu2 %v2425_v47 }
 0x429   : > { %v2320_v48 = vpop.f32.mrf.mxu2 }
 0x42a   : > { %v2321_v23 = vadd.f32 %v2320_v48, %v3757_v54 }
 0x42c   : > { %v2393_v33 = vmax.f32 %v2321_v23, 0.0 }
 0x42e   : > { %v2426_v30 = vmul.f32 %v3761_v15, %v2393_v33 }
 0x430   : > { %2463 = vadd.xlane.f32.xlu0 %v2426_v30 }
 0x431   : > { %v2323_v56 = vpop.f32.mrf.mxu2  ;;  %v2353_v57 = vpop.f32.mrf.mxu3 }
 0x432   : > { %v2324_v59 = vadd.f32 %v2323_v56, %v3757_v54  ;;  %v2354_v12 = vadd.f32 %v2353_v57, %v3757_v54 }
 0x434   : > { %v2394_v40 = vmax.f32 %v2324_v59, 0.0  ;;  %v2406_v49 = vmax.f32 %v2354_v12, 0.0 }
 0x436   : > { %v2427_v53 = vmul.f32 %v3761_v15, %v2394_v40  ;;  %v2439_v23 = vmul.f32 %v3761_v15, %v2406_v49 }
 0x438   : > { %2465 = vadd.xlane.f32.xlu1 %v2427_v53 }
 0x439   : > { %v2325_v51 = vpop.f32.mrf.mxu2  ;;  %v2355_v6 = vpop.f32.mrf.mxu3 }
 0x43a   : > { %v2326_v39 = vadd.f32 %v2325_v51, %v3757_v54  ;;  %v2356_v44 = vadd.f32 %v2355_v6, %v3757_v54 }
 0x43c   : > { %v2395_v60 = vmax.f32 %v2326_v39, 0.0  ;;  %v2407_v56 = vmax.f32 %v2356_v44, 0.0 }
 0x43e   : > { %v2428_v35 = vmul.f32 %v3761_v15, %v2395_v60  ;;  %v2440_v40 = vmul.f32 %v3761_v15, %v2407_v56 }
 0x440   : > { %2467 = vadd.xlane.f32.xlu2 %v2428_v35 }
 0x441   : > { %v2328_v63 = vpop.f32.mrf.mxu2  ;;  %v2358_v17 = vpop.f32.mrf.mxu3 }
 0x442   : > { %v2329_v2 = vadd.f32 %v2328_v63, %v3757_v54  ;;  %v2359_v18 = vadd.f32 %v2358_v17, %v3757_v54 }
 0x444   : > { %v2396_v5 = vmax.f32 %v2329_v2, 0.0  ;;  %v2408_v26 = vmax.f32 %v2359_v18, 0.0 }
 0x446   : > { %v2429_v3 = vmul.f32 %v3761_v15, %v2396_v5  ;;  %v2441_v48 = vmul.f32 %v3761_v15, %v2408_v26 }
 0x448   : > { %2469 = vadd.xlane.f32.xlu0 %v2429_v3 }
 0x449   : > { %v2330_v52 = vpop.f32.mrf.mxu2  ;;  %v2360_v61 = vpop.f32.mrf.mxu3 }
 0x44a   : > { %v2331_v9 = vadd.f32 %v2330_v52, %v3757_v54  ;;  %v2361_v33 = vadd.f32 %v2360_v61, %v3757_v54 }
 0x44c   : > { %v2397_v8 = vmax.f32 %v2331_v9, 0.0  ;;  %v2409_v59 = vmax.f32 %v2361_v33, 0.0 }
 0x44e   : > { %v2430_v19 = vmul.f32 %v3761_v15, %v2397_v8  ;;  %v2442_v39 = vmul.f32 %v3761_v15, %v2409_v59 }
 0x450   : > { %2481 = vadd.xlane.f32.xlu0 %v2435_v43  ;;  %2471 = vadd.xlane.f32.xlu1 %v2430_v19 }
 0x451   : > { %v2333_v21 = vpop.f32.mrf.mxu2  ;;  %v2363_v32 = vpop.f32.mrf.mxu3 }
 0x452   : > { %v2334_v22 = vadd.f32 %v2333_v21, %v3757_v54  ;;  %v2364_v53 = vadd.f32 %v2363_v32, %v3757_v54 }
 0x454   : > { %v2398_v20 = vmax.f32 %v2334_v22, 0.0  ;;  %v2410_v63 = vmax.f32 %v2364_v53, 0.0 }
 0x456   : > { %v2431_v36 = vmul.f32 %v3761_v15, %v2398_v20  ;;  %v2443_v38 = vmul.f32 %v3761_v15, %v2410_v63 }
 0x458   : > { %2473 = vadd.xlane.f32.xlu2 %v2431_v36  ;;  %2483 = vadd.xlane.f32.xlu1 %v2436_v25 }
 0x459   : > { %v2335_v37 = vpop.f32.mrf.mxu2  ;;  %v2365_v0 = vpop.f32.mrf.mxu3 }
 0x45a   : > { %v2336_v41 = vadd.f32 %v2335_v37, %v3757_v54  ;;  %v2366_v47 = vadd.f32 %v2365_v0, %v3757_v54 }
 0x45c   : > { %v2399_v13 = vmax.f32 %v2336_v41, 0.0  ;;  %v2411_v57 = vmax.f32 %v2366_v47, 0.0 }
 0x45e   : > { %v2432_v62 = vmul.f32 %v3761_v15, %v2399_v13  ;;  %v2444_v6 = vmul.f32 %v3761_v15, %v2411_v57 }
 0x460   : > { %2475 = vadd.xlane.f32.xlu0 %v2432_v62  ;;  %2485 = vadd.xlane.f32.xlu2 %v2437_v24 }
 0x461   : > { %v2338_v45 = vpop.f32.mrf.mxu2  ;;  %v2368_v11 = vpop.f32.mrf.mxu3 }
 0x462   : > { %v2339_v55 = vadd.f32 %v2338_v45, %v3757_v54  ;;  %v2369_v60 = vadd.f32 %v2368_v11, %v3757_v54 }
 0x464   : > { %v2400_v34 = vmax.f32 %v2339_v55, 0.0  ;;  %v2412_v2 = vmax.f32 %v2369_v60, 0.0 }
 0x466   : > { %v2433_v27 = vmul.f32 %v3761_v15, %v2400_v34  ;;  %v2445_v61 = vmul.f32 %v3761_v15, %v2412_v2 }
 0x468   : > { %2487 = vadd.xlane.f32.xlu0 %v2438_v16  ;;  %2477 = vadd.xlane.f32.xlu1 %v2433_v27 }
 0x469   : > { %v2340_v46 = vpop.f32.mrf.mxu2  ;;  %v2370_v7 = vpop.f32.mrf.mxu3 }
 0x46a   : > { %v2341_v4 = vadd.f32 %v2340_v46, %v3757_v54  ;;  %v2371_v3 = vadd.f32 %v2370_v7, %v3757_v54 }
 0x46c   : > { %v2401_v1 = vmax.f32 %v2341_v4, 0.0  ;;  %v2413_v8 = vmax.f32 %v2371_v3, 0.0 }
 0x46e   : > { %v2434_v50 = vmul.f32 %v3761_v15, %v2401_v1  ;;  %v2446_v43 = vmul.f32 %v3761_v15, %v2413_v8 }
 0x470   : > { %2479 = vadd.xlane.f32.xlu2 %v2434_v50  ;;  %2493 = vadd.xlane.f32.xlu0 %v2441_v48 }
 0x471   : > { %2489 = vadd.xlane.f32.xlu1 %v2439_v23  ;;  %v2373_v30 = vpop.f32.mrf.mxu3 }
 0x472   : > { %v2374_v51 = vadd.f32 %v2373_v30, %v3757_v54 }
 0x474   : > { %v2414_v17 = vmax.f32 %v2374_v51, 0.0 }
 0x476   : > { %v2447_v52 = vmul.f32 %v3761_v15, %v2414_v17 }
 0x478   : > { %2499 = vadd.xlane.f32.xlu0 %v2444_v6  ;;  %2491 = vadd.xlane.f32.xlu2 %v2440_v40 }
 0x479   : > { %2495 = vadd.xlane.f32.xlu1 %v2442_v39  ;;  %v2375_v35 = vpop.f32.mrf.mxu3 }
 0x47a   : > { %v2376_v42 = vadd.f32 %v2375_v35, %v3757_v54 }
 0x47b   : > { %v2454_v5 = vpop.xlane.xlu2 %2453 }
 0x47c   : > { %2518 = vst.msk [vmem:[%s3818_s23] sm:$0xff] %vm2517_vm1, %v2454_v5  ;;  %v2415_v14 = vmax.f32 %v2376_v42, 0.0 }
 0x47e   : > { %v2448_v32 = vmul.f32 %v3761_v15, %v2415_v14 }
 0x480   : > { %2497 = vadd.xlane.f32.xlu2 %v2443_v38  ;;  %2505 = vadd.xlane.f32.xlu0 %v2447_v52 }
 0x481   : > { %2501 = vadd.xlane.f32.xlu1 %v2445_v61  ;;  %v2378_v9 = vpop.f32.mrf.mxu3 }
 0x482   : > { %v2379_v21 = vadd.f32 %v2378_v9, %v3757_v54 }
 0x483   : > { %v2456_v19 = vpop.xlane.xlu0 %2455 }
 0x484   : > { %2519 = vst.msk [vmem:[%s3818_s23 + $0x8] sm:$0xff] %vm2517_vm1, %v2456_v19  ;;  %v2416_v22 = vmax.f32 %v2379_v21, 0.0 }
 0x486   : > { %v2449_v36 = vmul.f32 %v3761_v15, %v2416_v22 }
 0x488   : > { %2503 = vadd.xlane.f32.xlu2 %v2446_v43 }
 0x489   : > { %2507 = vadd.xlane.f32.xlu1 %v2448_v32  ;;  %v2380_v31 = vpop.f32.mrf.mxu3 }
 0x48a   : > { %v2381_v20 = vadd.f32 %v2380_v31, %v3757_v54 }
 0x48b   : > { %v2458_v25 = vpop.xlane.xlu1 %2457 }
 0x48c   : > { %v2417_v29 = vmax.f32 %v2381_v20, 0.0  ;;  %2520 = vst.msk [vmem:[%s3818_s23 + $0x10] sm:$0xff] %vm2517_vm1, %v2458_v25 }
 0x48e   : > { %v2450_v37 = vmul.f32 %v3761_v15, %v2417_v29 }
 0x490   : > { %2511 = vadd.xlane.f32.xlu0 %v2450_v37  ;;  %2509 = vadd.xlane.f32.xlu2 %v2449_v36 }
 0x491   : > { %v2383_v0 = vpop.f32.mrf.mxu3 }
 0x492   : > { %v2384_v10 = vadd.f32 %v2383_v0, %v3757_v54 }
 0x493   : > { %v2460_v41 = vpop.xlane.xlu2 %2459 }
 0x494   : > { %v2418_v13 = vmax.f32 %v2384_v10, 0.0  ;;  %2521 = vst.msk [vmem:[%s3818_s23 + $0x18] sm:$0xff] %vm2517_vm1, %v2460_v41 }
 0x496   : > { %v2451_v24 = vmul.f32 %v3761_v15, %v2418_v13 }
 0x498   : > { %2513 = vadd.xlane.f32.xlu1 %v2451_v24 }
 0x499   : > { %v2385_v28 = vpop.f32.mrf.mxu3 }
 0x49a   : > { %v2386_v62 = vadd.f32 %v2385_v28, %v3757_v54 }
 0x49b   : > { %v2462_v45 = vpop.xlane.xlu2 %2461 }
 0x49c   : > { %v2419_v11 = vmax.f32 %v2386_v62, 0.0  ;;  %2522 = vst.msk [vmem:[%s3818_s23 + $0x20] sm:$0xff] %vm2517_vm1, %v2462_v45 }
 0x49e   : > { %v2452_v58 = vmul.f32 %v3761_v15, %v2419_v11 }
 0x4a0   : > { %2515 = vadd.xlane.f32.xlu2 %v2452_v58 }
 0x4a3   : > { %v2464_v55 = vpop.xlane.xlu0 %2463 }
 0x4a4   : > { %2523 = vst.msk [vmem:[%s3818_s23 + $0x28] sm:$0xff] %vm2517_vm1, %v2464_v55 }
 0x4ab   : > { %v2466_v34 = vpop.xlane.xlu1 %2465 }
 0x4ac   : > { %2524 = vst.msk [vmem:[%s3818_s23 + $0x30] sm:$0xff] %vm2517_vm1, %v2466_v34 }
 0x4b3   : > { %v2468_v54 = vpop.xlane.xlu2 %2467 }
 0x4b4   : > { %2525 = vst.msk [vmem:[%s3818_s23 + $0x38] sm:$0xff] %vm2517_vm1, %v2468_v54 }
 0x4bb   : > { %v2470_v18 = vpop.xlane.xlu0 %2469 }
 0x4bc   : > { %2526 = vst.msk [vmem:[%s3818_s23 + $0x40] sm:$0xff] %vm2517_vm1, %v2470_v18 }
 0x4c3   : > { %v2482_v15 = vpop.xlane.xlu0 %2481  ;;  %v2472_v27 = vpop.xlane.xlu1 %2471 }
 0x4c4   : > { %2532 = vst.msk [vmem:[%s3818_s23 + $0x70] sm:$0xff] %vm2517_vm1, %v2482_v15 }
 0x4c5   : > { %2527 = vst.msk [vmem:[%s3818_s23 + $0x48] sm:$0xff] %vm2517_vm1, %v2472_v27 }
 0x4cb   : > { %v2474_v16 = vpop.xlane.xlu2 %2473  ;;  %v2484_v12 = vpop.xlane.xlu1 %2483 }
 0x4cc   : > { %2528 = vst.msk [vmem:[%s3818_s23 + $0x50] sm:$0xff] %vm2517_vm1, %v2474_v16 }
 0x4cd   : > { %2533 = vst.msk [vmem:[%s3818_s23 + $0x78] sm:$0xff] %vm2517_vm1, %v2484_v12 }
 0x4d3   : > { %v2476_v46 = vpop.xlane.xlu0 %2475  ;;  %v2486_v7 = vpop.xlane.xlu2 %2485 }
 0x4d4   : > { %2529 = vst.msk [vmem:[%s3818_s23 + $0x58] sm:$0xff] %vm2517_vm1, %v2476_v46 }
 0x4d5   : > { %2534 = vst.msk [vmem:[%s3818_s23 + $0x80] sm:$0xff] %vm2517_vm1, %v2486_v7 }
 0x4db   : > { %v2488_v26 = vpop.xlane.xlu0 %2487  ;;  %v2478_v4 = vpop.xlane.xlu1 %2477 }
 0x4dc   : > { %2535 = vst.msk [vmem:[%s3818_s23 + $0x88] sm:$0xff] %vm2517_vm1, %v2488_v26 }
 0x4dd   : > { %2530 = vst.msk [vmem:[%s3818_s23 + $0x60] sm:$0xff] %vm2517_vm1, %v2478_v4 }
 0x4e3   : > { %v2480_v49 = vpop.xlane.xlu2 %2479  ;;  %v2494_v1 = vpop.xlane.xlu0 %2493 }
 0x4e4   : > { %2531 = vst.msk [vmem:[%s3818_s23 + $0x68] sm:$0xff] %vm2517_vm1, %v2480_v49  ;;  %v2490_v44 = vpop.xlane.xlu1 %2489 }
 0x4e5   : > { %2538 = vst.msk [vmem:[%s3818_s23 + $0xa0] sm:$0xff] %vm2517_vm1, %v2494_v1 }
 0x4e6   : > { %2536 = vst.msk [vmem:[%s3818_s23 + $0x90] sm:$0xff] %vm2517_vm1, %v2490_v44 }
 0x4eb   : > { %v2500_v47 = vpop.xlane.xlu0 %2499  ;;  %v2492_v50 = vpop.xlane.xlu2 %2491 }
 0x4ec   : > { %2541 = vst.msk [vmem:[%s3818_s23 + $0xb8] sm:$0xff] %vm2517_vm1, %v2500_v47  ;;  %v2496_v48 = vpop.xlane.xlu1 %2495 }
 0x4ed   : > { %2537 = vst.msk [vmem:[%s3818_s23 + $0x98] sm:$0xff] %vm2517_vm1, %v2492_v50 }
 0x4ee   : > { %2539 = vst.msk [vmem:[%s3818_s23 + $0xa8] sm:$0xff] %vm2517_vm1, %v2496_v48 }
 0x4f3   : > { %v2498_v23 = vpop.xlane.xlu2 %2497  ;;  %v2506_v33 = vpop.xlane.xlu0 %2505 }
 0x4f4   : > { %2540 = vst.msk [vmem:[%s3818_s23 + $0xb0] sm:$0xff] %vm2517_vm1, %v2498_v23  ;;  %v2502_v30 = vpop.xlane.xlu1 %2501 }
 0x4f5   : > { %2544 = vst.msk [vmem:[%s3818_s23 + $0xd0] sm:$0xff] %vm2517_vm1, %v2506_v33 }
 0x4f6   : > { %2542 = vst.msk [vmem:[%s3818_s23 + $0xc0] sm:$0xff] %vm2517_vm1, %v2502_v30 }
 0x4fb   : > { %v2504_v56 = vpop.xlane.xlu2 %2503 }
 0x4fc   : > { %2543 = vst.msk [vmem:[%s3818_s23 + $0xc8] sm:$0xff] %vm2517_vm1, %v2504_v56  ;;  %v2508_v57 = vpop.xlane.xlu1 %2507 }
 0x4fd   : > { %2545 = vst.msk [vmem:[%s3818_s23 + $0xd8] sm:$0xff] %vm2517_vm1, %v2508_v57 }
 0x503   : > { %v2512_v59 = vpop.xlane.xlu0 %2511  ;;  %v2510_v40 = vpop.xlane.xlu2 %2509 }
 0x504   : > { %2547 = vst.msk [vmem:[%s3818_s23 + $0xe8] sm:$0xff] %vm2517_vm1, %v2512_v59 }
 0x505   : > { %2546 = vst.msk [vmem:[%s3818_s23 + $0xe0] sm:$0xff] %vm2517_vm1, %v2510_v40 }
 0x50b   : > { %v2514_v53 = vpop.xlane.xlu1 %2513 }
 0x50c   : > { %2548 = vst.msk [vmem:[%s3818_s23 + $0xf0] sm:$0xff] %vm2517_vm1, %v2514_v53 }
 0x513   : > { %v2516_v51 = vpop.xlane.xlu2 %2515 }
 0x514   : > { %2549 = vst.msk [vmem:[%s3818_s23 + $0xf8] sm:$0xff] %vm2517_vm1, %v2516_v51 }
 0x515 PF: > { %s15_s18 = sadd.s32 1, %s2975_s18  }
 0x516   : > { %p12_p5 = scmp.ge.s32.totalorder %s15_s18, 4  }
 0x518   :  { %14 = sbr.rel (!%p12_p5) target bundleno = 1 (0x1), region = 73 }

</bundles_post_ra>
